<compile_context>
chip_gen: v6e
topology: v6e:2x2x1
jax: 0.10.0
libtpu: 0.0.40
codegen_flags: <defaults>
</compile_context>

<pallas_src>
import jax
import jax.numpy as jnp
from jax import lax
from jax.experimental import pallas as pl
from jax.experimental.pallas import tpu as pltpu

# ---- small shapes consistent with the module (real ESM-1 uses embed_dim 768+) ----
B = 2               # batch
L = 8               # sequence length (token 0 is the CLS/BOS token)
D = 32              # esm1.args.embed_dim (scaled down)
H = 4               # attention heads
DH = D // H
F = 128             # FFN hidden (4 * D)
NUM_LAYERS = 12     # repr_layers=[12]
VOCAB = 33          # ESM alphabet size
PAD_IDX = 1         # esm1_alphabet.padding_idx
CLS_IDX = 0
NUM_LABELS = 19
MLP_HIDDEN = 512    # TAPE SimpleMLP hidden width inside SequenceClassificationHead
LOGIT_PAD = 128     # lane-dense padded logit width (sliced back to NUM_LABELS outside)


# ---------------------------------------------------------------------------
# shared elementwise math (f32)
# ---------------------------------------------------------------------------
def _layer_norm(x, g, b, eps=1e-5):
    mu = jnp.mean(x, axis=-1, keepdims=True)
    var = jnp.mean(jnp.square(x - mu), axis=-1, keepdims=True)
    return (x - mu) * lax.rsqrt(var + eps) * g + b


def _gelu(x):
    # TODO(synk): tanh approximation; torch F.gelu default is the exact erf form.
    c = 0.7978845608028654  # sqrt(2/pi)
    return 0.5 * x * (1.0 + jnp.tanh(c * (x + 0.044715 * x * x * x)))


# ---------------------------------------------------------------------------
# fused Pallas kernel: one grid step = (one sequence, one encoder layer)
# ---------------------------------------------------------------------------
def _make_fused_kernel(pooler_type):
    scale = 1.0 / (DH ** 0.5)

    def kernel(ids_ref, x_ref,
               wqkv_ref, bqkv_ref, wo_ref, bo_ref,
               ln1g_ref, ln1b_ref, ln2g_ref, ln2b_ref,
               wf1_ref, bf1_ref, wf2_ref, bf2_ref,
               hw1_ref, hb1_ref, hw2_ref, hb2_ref,
               out_ref, h_ref):
        l = pl.program_id(1)

        # ---- init the activation carry for this sequence ----
        @pl.when(l == 0)
        def _():
            h_ref[...] = x_ref[...].astype(jnp.float32)      # [L, D]

        h = h_ref[...]

        # ---- self-attention (pre-LN) ----
        hn = _layer_norm(h, ln1g_ref[...], ln1b_ref[...])
        qkv = jnp.dot(hn.astype(jnp.bfloat16), wqkv_ref[...],
                      preferred_element_type=jnp.float32) + bqkv_ref[...]     # [L, 3D]
        q = (qkv[:, :D] * scale).reshape(L, H, DH)            # scale folded into q
        k = qkv[:, D:2 * D].reshape(L, H, DH)
        v = qkv[:, 2 * D:].reshape(L, H, DH)
        s = jnp.einsum('qhd,khd->hqk',
                       q.astype(jnp.bfloat16), k.astype(jnp.bfloat16),
                       preferred_element_type=jnp.float32)                    # [H, L, L]
        # TODO(synk): no key-padding mask (PAD tokens attend / are attended),
        #             matching this file's stand-in encoder, not real ESM/BERT.
        m = jnp.max(s, axis=-1, keepdims=True)
        p = jnp.exp(s - m)
        p = p / jnp.sum(p, axis=-1, keepdims=True)            # exact softmax
        ctx = jnp.einsum('hqk,khd->qhd',
                         p.astype(jnp.bfloat16), v.astype(jnp.bfloat16),
                         preferred_element_type=jnp.float32).reshape(L, D)
        h = h + jnp.dot(ctx.astype(jnp.bfloat16), wo_ref[...],
                        preferred_element_type=jnp.float32) + bo_ref[...]

        # ---- FFN (pre-LN) ----
        hn2 = _layer_norm(h, ln2g_ref[...], ln2b_ref[...])
        f = jnp.dot(hn2.astype(jnp.bfloat16), wf1_ref[...],
                    preferred_element_type=jnp.float32) + bf1_ref[...]
        f = _gelu(f)
        f = jnp.dot(f.astype(jnp.bfloat16), wf2_ref[...],
                    preferred_element_type=jnp.float32) + bf2_ref[...]
        h = h + f
        h_ref[...] = h

        # ---- Pooler + SequenceClassificationHead (SimpleMLP) after the last layer ----
        @pl.when(l == NUM_LAYERS - 1)
        def _():
            if pooler_type == 'cls':
                # TODO(synk): source literally does last_hidden[:, 0, 0] (a scalar);
                #             we use the standard CLS vector last_hidden[:, 0, :].
                pooled = h[0:1, :]                                            # [1, D]
            elif pooler_type == 'avg':
                mask = (ids_ref[...] != PAD_IDX).astype(jnp.float32)          # [1, L]
                pooled = jnp.dot(mask, h, preferred_element_type=jnp.float32)  # masked sum
                pooled = pooled * pl.reciprocal(
                    jnp.sum(mask, axis=-1, keepdims=True), approx=True)
            else:
                raise NotImplementedError(pooler_type)
            hid = jnp.dot(pooled.astype(jnp.bfloat16), hw1_ref[...],
                          preferred_element_type=jnp.float32) + hb1_ref[...]
            hid = jnp.maximum(hid, 0.0)
            logits = jnp.dot(hid.astype(jnp.bfloat16), hw2_ref[...],
                             preferred_element_type=jnp.float32) + hb2_ref[...]
            out_ref[...] = logits                                             # [1, 128]

    return kernel


def protein_bert_forward(input_ids, params, targets=None, pooler_type='cls'):
    """ProteinBertForSequenceClassification.forward -> (logits,)"""
    # TODO(synk): torch.cuda.amp.autocast is modeled as bf16 matmul operands with
    #             f32 accumulation; elementwise math stays f32.
    # TODO(synk): pretrained esm1 weights unavailable; a deterministically
    #             initialized 12-layer pre-LN transformer stands in for
    #             self.bert(...)['representations'][12].
    # TODO(synk): targets / CrossEntropyLoss branch of the head is not implemented.
    emb = params['embed'][input_ids].astype(jnp.float32)      # glue: gather -> [B, L, D]
    ids3 = input_ids.reshape(B, 1, L)
    e, hd = params['encoder'], params['head']

    def per_layer(shape):
        # one layer slice, layer dim squeezed out of the kernel ref
        nd = len(shape)
        return pl.BlockSpec((None,) + tuple(shape[1:]),
                            lambda b, l, _nd=nd: (l,) + (0,) * (_nd - 1))

    def const(shape):
        nd = len(shape)
        return pl.BlockSpec(tuple(shape), lambda b, l, _nd=nd: (0,) * _nd)

    in_specs = [
        pl.BlockSpec((None, 1, L), lambda b, l: (b, 0, 0)),    # ids (per sequence)
        pl.BlockSpec((None, L, D), lambda b, l: (b, 0, 0)),    # embeddings (per sequence)
        per_layer(e['wqkv'].shape), per_layer(e['bqkv'].shape),
        per_layer(e['wo'].shape), per_layer(e['bo'].shape),
        per_layer(e['ln1_g'].shape), per_layer(e['ln1_b'].shape),
        per_layer(e['ln2_g'].shape), per_layer(e['ln2_b'].shape),
        per_layer(e['w_ffn1'].shape), per_layer(e['b_ffn1'].shape),
        per_layer(e['w_ffn2'].shape), per_layer(e['b_ffn2'].shape),
        const(hd['w1'].shape), const(hd['b1'].shape),
        const(hd['w2_pad'].shape), const(hd['b2_pad'].shape),
    ]
    out_spec = pl.BlockSpec((None, 1, LOGIT_PAD), lambda b, l: (b, 0, 0))

    padded = pl.pallas_call(
        _make_fused_kernel(pooler_type),
        out_shape=jax.ShapeDtypeStruct((B, 1, LOGIT_PAD), jnp.float32),
        grid=(B, NUM_LAYERS),
        in_specs=in_specs,
        out_specs=out_spec,
        scratch_shapes=[pltpu.VMEM((L, D), jnp.float32)],      # activation carry
        compiler_params=pltpu.CompilerParams(
            dimension_semantics=("parallel", "arbitrary")),
    )(ids3, emb,
      e['wqkv'], e['bqkv'], e['wo'], e['bo'],
      e['ln1_g'], e['ln1_b'], e['ln2_g'], e['ln2_b'],
      e['w_ffn1'], e['b_ffn1'], e['w_ffn2'], e['b_ffn2'],
      hd['w1'], hd['b1'], hd['w2_pad'], hd['b2_pad'])
    return (padded.reshape(B, LOGIT_PAD)[:, :NUM_LABELS],)


# ---------------------------------------------------------------------------
# independent pure-JAX reference (same math, standard [B, L, D] formulation)
# ---------------------------------------------------------------------------
def _ref_encoder_layer(h, wqkv, bqkv, wo, bo, g1, b1, g2, b2, w1, bf1, w2, bf2):
    b_, l_, _ = h.shape
    scale = 1.0 / (DH ** 0.5)
    hn = _layer_norm(h, g1, b1)
    qkv = jnp.einsum('bld,de->ble', hn.astype(jnp.bfloat16), wqkv,
                     preferred_element_type=jnp.float32) + bqkv
    q = qkv[..., :D].reshape(b_, l_, H, DH)
    k = qkv[..., D:2 * D].reshape(b_, l_, H, DH)
    v = qkv[..., 2 * D:].reshape(b_, l_, H, DH)
    s = jnp.einsum('bqhd,bkhd->bhqk', q.astype(jnp.bfloat16), k.astype(jnp.bfloat16),
                   preferred_element_type=jnp.float32) * scale
    m = jnp.max(s, axis=-1, keepdims=True)
    p = jnp.exp(s - m)
    p = p / jnp.sum(p, axis=-1, keepdims=True)
    ctx = jnp.einsum('bhqk,bkhd->bqhd', p.astype(jnp.bfloat16), v.astype(jnp.bfloat16),
                     preferred_element_type=jnp.float32).reshape(b_, l_, D)
    h = h + jnp.einsum('bqd,de->bqe', ctx.astype(jnp.bfloat16), wo,
                       preferred_element_type=jnp.float32) + bo
    hn2 = _layer_norm(h, g2, b2)
    f = jnp.einsum('bld,df->blf', hn2.astype(jnp.bfloat16), w1,
                   preferred_element_type=jnp.float32) + bf1
    f = _gelu(f)
    f = jnp.einsum('blf,fd->bld', f.astype(jnp.bfloat16), w2,
                   preferred_element_type=jnp.float32) + bf2
    return h + f


def reference_forward(input_ids, params, pooler_type='cls'):
    h = params['embed'][input_ids].astype(jnp.float32)                    # [B, L, D]
    e = params['encoder']
    for l in range(NUM_LAYERS):
        h = _ref_encoder_layer(h, e['wqkv'][l], e['bqkv'][l], e['wo'][l], e['bo'][l],
                               e['ln1_g'][l], e['ln1_b'][l], e['ln2_g'][l], e['ln2_b'][l],
                               e['w_ffn1'][l], e['b_ffn1'][l], e['w_ffn2'][l], e['b_ffn2'][l])
    if pooler_type == 'cls':
        pooled = h[:, 0, :]
    elif pooler_type == 'avg':
        mask = (input_ids != PAD_IDX).astype(jnp.float32)
        pooled = (h * mask[:, :, None]).sum(axis=1) / mask.sum(axis=-1, keepdims=True)
    else:
        raise NotImplementedError(pooler_type)
    hd = params['head']
    hid = jnp.maximum(jnp.dot(pooled.astype(jnp.bfloat16), hd['w1'],
                              preferred_element_type=jnp.float32) + hd['b1'], 0.0)
    logits = jnp.dot(hid.astype(jnp.bfloat16), hd['w2_pad'],
                     preferred_element_type=jnp.float32) + hd['b2_pad']
    return logits[:, :NUM_LABELS]


# ---------------------------------------------------------------------------
# deterministic parameter initialization (shapes implied by the module __init__)
# ---------------------------------------------------------------------------
def init_params(key):
    keys = iter(jax.random.split(key, 8))

    def nrm(shape, fan_in):
        w = jax.random.normal(next(keys), shape, jnp.float32) / jnp.sqrt(float(fan_in))
        return w.astype(jnp.bfloat16)            # weights stored bf16 (MXU operands)

    zeros = lambda shape: jnp.zeros(shape, jnp.float32)
    ones = lambda shape: jnp.ones(shape, jnp.float32)

    enc = dict(
        wqkv=nrm((NUM_LAYERS, D, 3 * D), D), bqkv=zeros((NUM_LAYERS, 1, 3 * D)),
        wo=nrm((NUM_LAYERS, D, D), D), bo=zeros((NUM_LAYERS, 1, D)),
        ln1_g=ones((NUM_LAYERS, 1, D)), ln1_b=zeros((NUM_LAYERS, 1, D)),
        ln2_g=ones((NUM_LAYERS, 1, D)), ln2_b=zeros((NUM_LAYERS, 1, D)),
        w_ffn1=nrm((NUM_LAYERS, D, F), D), b_ffn1=zeros((NUM_LAYERS, 1, F)),
        w_ffn2=nrm((NUM_LAYERS, F, D), F), b_ffn2=zeros((NUM_LAYERS, 1, D)),
    )
    # SequenceClassificationHead(esm1.args.embed_dim, 19) == SimpleMLP(D, 512, 19)
    # TODO(synk): TAPE wraps these linears in weight_norm(dim=None) + Dropout; at a
    #             fresh init weight_norm is the identity and dropout is inactive.
    w2 = nrm((MLP_HIDDEN, NUM_LABELS), MLP_HIDDEN)
    w2_pad = jnp.zeros((MLP_HIDDEN, LOGIT_PAD), jnp.bfloat16).at[:, :NUM_LABELS].set(w2)
    head = dict(
        w1=nrm((D, MLP_HIDDEN), D), b1=zeros((1, MLP_HIDDEN)),
        w2_pad=w2_pad, b2_pad=zeros((1, LOGIT_PAD)),
    )
    embed = jax.random.normal(next(keys), (VOCAB, D), jnp.float32)
    return dict(embed=embed, encoder=enc, head=head)


if __name__ == "__main__":
    key = jax.random.PRNGKey(0)
    pkey, dkey = jax.random.split(key)
    params = init_params(pkey)

    input_ids = jax.random.randint(dkey, (B, L), 0, VOCAB, dtype=jnp.int32)
    input_ids = input_ids.at[:, 0].set(CLS_IDX)      # CLS/BOS token at position 0
    input_ids = input_ids.at[:, -1].set(PAD_IDX)     # some padding

    # 'cls' pooler (module default)
    (logits,) = protein_bert_forward(input_ids, params, pooler_type='cls')
    logits = jax.block_until_ready(logits)
    assert logits.shape == (B, NUM_LABELS) and logits.dtype == jnp.float32
    ref_cls = reference_forward(input_ids, params, 'cls')
    assert jnp.allclose(logits, ref_cls, rtol=5e-2, atol=5e-2), (logits, ref_cls)

    # also exercise the 'avg' branch of the Pooler (masked mean, in-kernel)
    (avg_logits,) = protein_bert_forward(input_ids, params, pooler_type='avg')
    avg_logits = jax.block_until_ready(avg_logits)
    ref_avg = reference_forward(input_ids, params, 'avg')
    assert jnp.allclose(avg_logits, ref_avg, rtol=5e-2, atol=5e-2), (avg_logits, ref_avg)

    print("KERNEL_OK")
</pallas_src>

<mosaic_0001>
module attributes {stable_mosaic.version = 11 : i64} {
  func.func @kernel(%arg0: i32, %arg1: i32, %arg2: memref<1x1x8xi32, #tpu.memory_space<vmem>>, %arg3: memref<1x8x32xf32, #tpu.memory_space<vmem>>, %arg4: memref<1x32x96xbf16, #tpu.memory_space<vmem>>, %arg5: memref<1x1x96xf32, #tpu.memory_space<vmem>>, %arg6: memref<1x32x32xbf16, #tpu.memory_space<vmem>>, %arg7: memref<1x1x32xf32, #tpu.memory_space<vmem>>, %arg8: memref<1x1x32xf32, #tpu.memory_space<vmem>>, %arg9: memref<1x1x32xf32, #tpu.memory_space<vmem>>, %arg10: memref<1x1x32xf32, #tpu.memory_space<vmem>>, %arg11: memref<1x1x32xf32, #tpu.memory_space<vmem>>, %arg12: memref<1x32x128xbf16, #tpu.memory_space<vmem>>, %arg13: memref<1x1x128xf32, #tpu.memory_space<vmem>>, %arg14: memref<1x128x32xbf16, #tpu.memory_space<vmem>>, %arg15: memref<1x1x32xf32, #tpu.memory_space<vmem>>, %arg16: memref<32x512xbf16, #tpu.memory_space<vmem>>, %arg17: memref<1x512xf32, #tpu.memory_space<vmem>>, %arg18: memref<512x128xbf16, #tpu.memory_space<vmem>>, %arg19: memref<1x128xf32, #tpu.memory_space<vmem>>, %arg20: memref<1x1x128xf32, #tpu.memory_space<vmem>>, %arg21: memref<8x32xf32, #tpu.memory_space<vmem>>) attributes {dimension_semantics = [#tpu.dimension_semantics<parallel>, #tpu.dimension_semantics<arbitrary>], iteration_bounds = array<i64: 2, 12>, scalar_prefetch = 0 : i64, scratch_operands = 1 : i64, tpu.core_type = #tpu.core_type<tc>, window_params = [{transform_indices = @transform_0, window_bounds = array<i64: 1, 1, 8>}, {transform_indices = @transform_1, window_bounds = array<i64: 1, 8, 32>}, {transform_indices = @transform_2, window_bounds = array<i64: 1, 32, 96>}, {transform_indices = @transform_3, window_bounds = array<i64: 1, 1, 96>}, {transform_indices = @transform_4, window_bounds = array<i64: 1, 32, 32>}, {transform_indices = @transform_5, window_bounds = array<i64: 1, 1, 32>}, {transform_indices = @transform_6, window_bounds = array<i64: 1, 1, 32>}, {transform_indices = @transform_7, window_bounds = array<i64: 1, 1, 32>}, {transform_indices = @transform_8, window_bounds = array<i64: 1, 1, 32>}, {transform_indices = @transform_9, window_bounds = array<i64: 1, 1, 32>}, {transform_indices = @transform_10, window_bounds = array<i64: 1, 32, 128>}, {transform_indices = @transform_11, window_bounds = array<i64: 1, 1, 128>}, {transform_indices = @transform_12, window_bounds = array<i64: 1, 128, 32>}, {transform_indices = @transform_13, window_bounds = array<i64: 1, 1, 32>}, {pipeline_mode = #tpu.pipeline_mode<synchronous>, transform_indices = @transform_14, window_bounds = array<i64: 32, 512>}, {pipeline_mode = #tpu.pipeline_mode<synchronous>, transform_indices = @transform_15, window_bounds = array<i64: 1, 512>}, {pipeline_mode = #tpu.pipeline_mode<synchronous>, transform_indices = @transform_16, window_bounds = array<i64: 512, 128>}, {pipeline_mode = #tpu.pipeline_mode<synchronous>, transform_indices = @transform_17, window_bounds = array<i64: 1, 128>}, {transform_indices = @transform_18, window_bounds = array<i64: 1, 1, 128>}]} {
    %c0_i32 = arith.constant 0 : i32
    %0 = arith.cmpi eq, %arg1, %c0_i32 : i32
    %1 = arith.extui %0 : i1 to i32
    %c0_i32_0 = arith.constant 0 : i32
    %2 = arith.cmpi ne, %1, %c0_i32_0 : i32
    scf.if %2 {
      %c0_63 = arith.constant 0 : index
      %c0_64 = arith.constant 0 : index
      %c0_65 = arith.constant 0 : index
      %132 = vector.load %arg3[%c0_63, %c0_64, %c0_65] : memref<1x8x32xf32, #tpu.memory_space<vmem>>, vector<1x8x32xf32>
      %133 = vector.shape_cast %132 : vector<1x8x32xf32> to vector<8x32xf32>
      %c0_66 = arith.constant 0 : index
      %c0_67 = arith.constant 0 : index
      %134 = vector.load %arg21[%c0_66, %c0_67] : memref<8x32xf32, #tpu.memory_space<vmem>>, vector<8x32xf32>
      tpu.vector_store %arg21[%c0_66, %c0_67], %133 {strides = array<i32>} : memref<8x32xf32, #tpu.memory_space<vmem>>, vector<8x32xf32>,
    } else {
    }
    %c0 = arith.constant 0 : index
    %c0_1 = arith.constant 0 : index
    %3 = vector.load %arg21[%c0, %c0_1] : memref<8x32xf32, #tpu.memory_space<vmem>>, vector<8x32xf32>
    %c0_2 = arith.constant 0 : index
    %c0_3 = arith.constant 0 : index
    %c0_4 = arith.constant 0 : index
    %4 = vector.load %arg8[%c0_2, %c0_3, %c0_4] : memref<1x1x32xf32, #tpu.memory_space<vmem>>, vector<1x1x32xf32>
    %5 = vector.shape_cast %4 : vector<1x1x32xf32> to vector<1x32xf32>
    %c0_5 = arith.constant 0 : index
    %c0_6 = arith.constant 0 : index
    %c0_7 = arith.constant 0 : index
    %6 = vector.load %arg9[%c0_5, %c0_6, %c0_7] : memref<1x1x32xf32, #tpu.memory_space<vmem>>, vector<1x1x32xf32>
    %7 = vector.shape_cast %6 : vector<1x1x32xf32> to vector<1x32xf32>
    %cst = arith.constant dense<0.000000e+00> : vector<8xf32>
    %8 = vector.multi_reduction <add>, %3, %cst [1] : vector<8x32xf32> to vector<8xf32>
    %9 = vector.shape_cast %8 : vector<8xf32> to vector<8x1xf32>
    %cst_8 = arith.constant 3.200000e+01 : f32
    %10 = vector.broadcast %cst_8 : f32 to vector<8x1xf32>
    %11 = arith.divf %9, %10 : vector<8x1xf32>
    %12 = vector.broadcast %11 : vector<8x1xf32> to vector<8x32xf32>
    %13 = arith.subf %3, %12 : vector<8x32xf32>
    %14 = arith.mulf %13, %13 : vector<8x32xf32>
    %cst_9 = arith.constant dense<0.000000e+00> : vector<8xf32>
    %15 = vector.multi_reduction <add>, %14, %cst_9 [1] : vector<8x32xf32> to vector<8xf32>
    %16 = vector.shape_cast %15 : vector<8xf32> to vector<8x1xf32>
    %cst_10 = arith.constant 3.200000e+01 : f32
    %17 = vector.broadcast %cst_10 : f32 to vector<8x1xf32>
    %18 = arith.divf %16, %17 : vector<8x1xf32>
    %19 = vector.broadcast %11 : vector<8x1xf32> to vector<8x32xf32>
    %20 = arith.subf %3, %19 : vector<8x32xf32>
    %cst_11 = arith.constant 9.99999974E-6 : f32
    %21 = vector.broadcast %cst_11 : f32 to vector<8x1xf32>
    %22 = arith.addf %18, %21 : vector<8x1xf32>
    %23 = math.rsqrt %22 : vector<8x1xf32>
    %24 = vector.broadcast %23 : vector<8x1xf32> to vector<8x32xf32>
    %25 = arith.mulf %20, %24 : vector<8x32xf32>
    %26 = vector.broadcast %5 : vector<1x32xf32> to vector<8x32xf32>
    %27 = arith.mulf %25, %26 : vector<8x32xf32>
    %28 = vector.broadcast %7 : vector<1x32xf32> to vector<8x32xf32>
    %29 = arith.addf %27, %28 : vector<8x32xf32>
    %30 = arith.truncf %29 : vector<8x32xf32> to vector<8x32xbf16>
    %c0_12 = arith.constant 0 : index
    %c0_13 = arith.constant 0 : index
    %c0_14 = arith.constant 0 : index
    %31 = vector.load %arg4[%c0_12, %c0_13, %c0_14] : memref<1x32x96xbf16, #tpu.memory_space<vmem>>, vector<1x32x96xbf16>
    %32 = vector.shape_cast %31 : vector<1x32x96xbf16> to vector<32x96xbf16>
    %cst_15 = arith.constant dense<0.000000e+00> : vector<8x96xf32>
    %33 = tpu.matmul %30, %32, %cst_15 {dimension_numbers = #tpu.dot_dimension_numbers<[1], [0], [0], [1], [0, 0, 1, 1], [], []>} : vector<8x32xbf16>, vector<32x96xbf16>, vector<8x96xf32> -> vector<8x96xf32>
    %c0_16 = arith.constant 0 : index
    %c0_17 = arith.constant 0 : index
    %c0_18 = arith.constant 0 : index
    %34 = vector.load %arg5[%c0_16, %c0_17, %c0_18] : memref<1x1x96xf32, #tpu.memory_space<vmem>>, vector<1x1x96xf32>
    %35 = vector.shape_cast %34 : vector<1x1x96xf32> to vector<1x96xf32>
    %36 = vector.broadcast %35 : vector<1x96xf32> to vector<8x96xf32>
    %37 = arith.addf %33, %36 : vector<8x96xf32>
    %38 = vector.extract_strided_slice %37 {offsets = [0, 0], sizes = [8, 32], strides = [1, 1]} : vector<8x96xf32> to vector<8x32xf32>
    %cst_19 = arith.constant 0.353553385 : f32
    %39 = vector.broadcast %cst_19 : f32 to vector<8x32xf32>
    %40 = arith.mulf %38, %39 : vector<8x32xf32>
    %41 = vector.shape_cast %40 : vector<8x32xf32> to vector<8x4x8xf32>
    %42 = vector.extract_strided_slice %37 {offsets = [0, 32], sizes = [8, 32], strides = [1, 1]} : vector<8x96xf32> to vector<8x32xf32>
    %43 = vector.shape_cast %42 : vector<8x32xf32> to vector<8x4x8xf32>
    %44 = vector.extract_strided_slice %37 {offsets = [0, 64], sizes = [8, 32], strides = [1, 1]} : vector<8x96xf32> to vector<8x32xf32>
    %45 = vector.shape_cast %44 : vector<8x32xf32> to vector<8x4x8xf32>
    %46 = arith.truncf %41 : vector<8x4x8xf32> to vector<8x4x8xbf16>
    %47 = arith.truncf %43 : vector<8x4x8xf32> to vector<8x4x8xbf16>
    "tpu.trace_start"() <{level = 10 : i32, message = "qhd,khd->hqk"}> : () -> ()
    %cst_20 = arith.constant dense<0.000000e+00> : vector<4x8x8xf32>
    %48 = tpu.matmul %46, %47, %cst_20 {dimension_numbers = #tpu.dot_dimension_numbers<[2], [2], [0], [0], [0, 1, 0, 0, 1, 0], [1], [1]>} : vector<8x4x8xbf16>, vector<8x4x8xbf16>, vector<4x8x8xf32> -> vector<4x8x8xf32>
    "tpu.trace_stop"() : () -> ()
    %cst_21 = arith.constant dense<0xFF800000> : vector<4x8xf32>
    %49 = vector.multi_reduction <maximumf>, %48, %cst_21 [2] : vector<4x8x8xf32> to vector<4x8xf32>
    %50 = vector.shape_cast %49 : vector<4x8xf32> to vector<4x8x1xf32>
    %51 = vector.broadcast %50 : vector<4x8x1xf32> to vector<4x8x8xf32>
    %52 = arith.subf %48, %51 : vector<4x8x8xf32>
    %53 = math.exp %52 : vector<4x8x8xf32>
    %cst_22 = arith.constant dense<0.000000e+00> : vector<4x8xf32>
    %54 = vector.multi_reduction <add>, %53, %cst_22 [2] : vector<4x8x8xf32> to vector<4x8xf32>
    %55 = vector.shape_cast %54 : vector<4x8xf32> to vector<4x8x1xf32>
    %56 = vector.broadcast %55 : vector<4x8x1xf32> to vector<4x8x8xf32>
    %57 = arith.divf %53, %56 : vector<4x8x8xf32>
    %58 = arith.truncf %57 : vector<4x8x8xf32> to vector<4x8x8xbf16>
    %59 = arith.truncf %45 : vector<8x4x8xf32> to vector<8x4x8xbf16>
    "tpu.trace_start"() <{level = 10 : i32, message = "hqk,khd->qhd"}> : () -> ()
    %cst_23 = arith.constant dense<0.000000e+00> : vector<4x8x8xf32>
    %60 = tpu.matmul %59, %58, %cst_23 {dimension_numbers = #tpu.dot_dimension_numbers<[0], [2], [2], [1], [0, 1, 0, 2, 1, 1], [1], [0]>} : vector<8x4x8xbf16>, vector<4x8x8xbf16>, vector<4x8x8xf32> -> vector<4x8x8xf32>
    %61 = tpu.transpose %60, [2, 0, 1] : vector<4x8x8xf32> -> vector<8x4x8xf32>
    "tpu.trace_stop"() : () -> ()
    %62 = vector.shape_cast %61 : vector<8x4x8xf32> to vector<8x32xf32>
    %63 = arith.truncf %62 : vector<8x32xf32> to vector<8x32xbf16>
    %c0_24 = arith.constant 0 : index
    %c0_25 = arith.constant 0 : index
    %c0_26 = arith.constant 0 : index
    %64 = vector.load %arg6[%c0_24, %c0_25, %c0_26] : memref<1x32x32xbf16, #tpu.memory_space<vmem>>, vector<1x32x32xbf16>
    %65 = vector.shape_cast %64 : vector<1x32x32xbf16> to vector<32x32xbf16>
    %cst_27 = arith.constant dense<0.000000e+00> : vector<8x32xf32>
    %66 = tpu.matmul %63, %65, %cst_27 {dimension_numbers = #tpu.dot_dimension_numbers<[1], [0], [0], [1], [0, 0, 1, 1], [], []>} : vector<8x32xbf16>, vector<32x32xbf16>, vector<8x32xf32> -> vector<8x32xf32>
    %67 = arith.addf %3, %66 : vector<8x32xf32>
    %c0_28 = arith.constant 0 : index
    %c0_29 = arith.constant 0 : index
    %c0_30 = arith.constant 0 : index
    %68 = vector.load %arg7[%c0_28, %c0_29, %c0_30] : memref<1x1x32xf32, #tpu.memory_space<vmem>>, vector<1x1x32xf32>
    %69 = vector.shape_cast %68 : vector<1x1x32xf32> to vector<1x32xf32>
    %70 = vector.broadcast %69 : vector<1x32xf32> to vector<8x32xf32>
    %71 = arith.addf %67, %70 : vector<8x32xf32>
    %c0_31 = arith.constant 0 : index
    %c0_32 = arith.constant 0 : index
    %c0_33 = arith.constant 0 : index
    %72 = vector.load %arg10[%c0_31, %c0_32, %c0_33] : memref<1x1x32xf32, #tpu.memory_space<vmem>>, vector<1x1x32xf32>
    %73 = vector.shape_cast %72 : vector<1x1x32xf32> to vector<1x32xf32>
    %c0_34 = arith.constant 0 : index
    %c0_35 = arith.constant 0 : index
    %c0_36 = arith.constant 0 : index
    %74 = vector.load %arg11[%c0_34, %c0_35, %c0_36] : memref<1x1x32xf32, #tpu.memory_space<vmem>>, vector<1x1x32xf32>
    %75 = vector.shape_cast %74 : vector<1x1x32xf32> to vector<1x32xf32>
    %cst_37 = arith.constant dense<0.000000e+00> : vector<8xf32>
    %76 = vector.multi_reduction <add>, %71, %cst_37 [1] : vector<8x32xf32> to vector<8xf32>
    %77 = vector.shape_cast %76 : vector<8xf32> to vector<8x1xf32>
    %cst_38 = arith.constant 3.200000e+01 : f32
    %78 = vector.broadcast %cst_38 : f32 to vector<8x1xf32>
    %79 = arith.divf %77, %78 : vector<8x1xf32>
    %80 = vector.broadcast %79 : vector<8x1xf32> to vector<8x32xf32>
    %81 = arith.subf %71, %80 : vector<8x32xf32>
    %82 = arith.mulf %81, %81 : vector<8x32xf32>
    %cst_39 = arith.constant dense<0.000000e+00> : vector<8xf32>
    %83 = vector.multi_reduction <add>, %82, %cst_39 [1] : vector<8x32xf32> to vector<8xf32>
    %84 = vector.shape_cast %83 : vector<8xf32> to vector<8x1xf32>
    %cst_40 = arith.constant 3.200000e+01 : f32
    %85 = vector.broadcast %cst_40 : f32 to vector<8x1xf32>
    %86 = arith.divf %84, %85 : vector<8x1xf32>
    %87 = vector.broadcast %79 : vector<8x1xf32> to vector<8x32xf32>
    %88 = arith.subf %71, %87 : vector<8x32xf32>
    %cst_41 = arith.constant 9.99999974E-6 : f32
    %89 = vector.broadcast %cst_41 : f32 to vector<8x1xf32>
    %90 = arith.addf %86, %89 : vector<8x1xf32>
    %91 = math.rsqrt %90 : vector<8x1xf32>
    %92 = vector.broadcast %91 : vector<8x1xf32> to vector<8x32xf32>
    %93 = arith.mulf %88, %92 : vector<8x32xf32>
    %94 = vector.broadcast %73 : vector<1x32xf32> to vector<8x32xf32>
    %95 = arith.mulf %93, %94 : vector<8x32xf32>
    %96 = vector.broadcast %75 : vector<1x32xf32> to vector<8x32xf32>
    %97 = arith.addf %95, %96 : vector<8x32xf32>
    %98 = arith.truncf %97 : vector<8x32xf32> to vector<8x32xbf16>
    %c0_42 = arith.constant 0 : index
    %c0_43 = arith.constant 0 : index
    %c0_44 = arith.constant 0 : index
    %99 = vector.load %arg12[%c0_42, %c0_43, %c0_44] : memref<1x32x128xbf16, #tpu.memory_space<vmem>>, vector<1x32x128xbf16>
    %100 = vector.shape_cast %99 : vector<1x32x128xbf16> to vector<32x128xbf16>
    %cst_45 = arith.constant dense<0.000000e+00> : vector<8x128xf32>
    %101 = tpu.matmul %98, %100, %cst_45 {dimension_numbers = #tpu.dot_dimension_numbers<[1], [0], [0], [1], [0, 0, 1, 1], [], []>} : vector<8x32xbf16>, vector<32x128xbf16>, vector<8x128xf32> -> vector<8x128xf32>
    %c0_46 = arith.constant 0 : index
    %c0_47 = arith.constant 0 : index
    %c0_48 = arith.constant 0 : index
    %102 = vector.load %arg13[%c0_46, %c0_47, %c0_48] : memref<1x1x128xf32, #tpu.memory_space<vmem>>, vector<1x1x128xf32>
    %103 = vector.shape_cast %102 : vector<1x1x128xf32> to vector<1x128xf32>
    %104 = vector.broadcast %103 : vector<1x128xf32> to vector<8x128xf32>
    %105 = arith.addf %101, %104 : vector<8x128xf32>
    %cst_49 = arith.constant 5.000000e-01 : f32
    %106 = vector.broadcast %cst_49 : f32 to vector<8x128xf32>
    %107 = arith.mulf %106, %105 : vector<8x128xf32>
    %cst_50 = arith.constant 4.471500e-02 : f32
    %108 = vector.broadcast %cst_50 : f32 to vector<8x128xf32>
    %109 = arith.mulf %108, %105 : vector<8x128xf32>
    %110 = arith.mulf %109, %105 : vector<8x128xf32>
    %111 = arith.mulf %110, %105 : vector<8x128xf32>
    %112 = arith.addf %105, %111 : vector<8x128xf32>
    %cst_51 = arith.constant 0.797884583 : f32
    %113 = vector.broadcast %cst_51 : f32 to vector<8x128xf32>
    %114 = arith.mulf %113, %112 : vector<8x128xf32>
    %115 = math.tanh %114 : vector<8x128xf32>
    %cst_52 = arith.constant 1.000000e+00 : f32
    %116 = vector.broadcast %cst_52 : f32 to vector<8x128xf32>
    %117 = arith.addf %116, %115 : vector<8x128xf32>
    %118 = arith.mulf %107, %117 : vector<8x128xf32>
    %119 = arith.truncf %118 : vector<8x128xf32> to vector<8x128xbf16>
    %c0_53 = arith.constant 0 : index
    %c0_54 = arith.constant 0 : index
    %c0_55 = arith.constant 0 : index
    %120 = vector.load %arg14[%c0_53, %c0_54, %c0_55] : memref<1x128x32xbf16, #tpu.memory_space<vmem>>, vector<1x128x32xbf16>
    %121 = vector.shape_cast %120 : vector<1x128x32xbf16> to vector<128x32xbf16>
    %cst_56 = arith.constant dense<0.000000e+00> : vector<8x32xf32>
    %122 = tpu.matmul %119, %121, %cst_56 {dimension_numbers = #tpu.dot_dimension_numbers<[1], [0], [0], [1], [0, 0, 1, 1], [], []>} : vector<8x128xbf16>, vector<128x32xbf16>, vector<8x32xf32> -> vector<8x32xf32>
    %c0_57 = arith.constant 0 : index
    %c0_58 = arith.constant 0 : index
    %c0_59 = arith.constant 0 : index
    %123 = vector.load %arg15[%c0_57, %c0_58, %c0_59] : memref<1x1x32xf32, #tpu.memory_space<vmem>>, vector<1x1x32xf32>
    %124 = vector.shape_cast %123 : vector<1x1x32xf32> to vector<1x32xf32>
    %125 = vector.broadcast %124 : vector<1x32xf32> to vector<8x32xf32>
    %126 = arith.addf %122, %125 : vector<8x32xf32>
    %127 = arith.addf %71, %126 : vector<8x32xf32>
    %c0_60 = arith.constant 0 : index
    %c0_61 = arith.constant 0 : index
    %128 = vector.load %arg21[%c0_60, %c0_61] : memref<8x32xf32, #tpu.memory_space<vmem>>, vector<8x32xf32>
    tpu.vector_store %arg21[%c0_60, %c0_61], %127 {strides = array<i32>} : memref<8x32xf32, #tpu.memory_space<vmem>>, vector<8x32xf32>,
    %c11_i32 = arith.constant 11 : i32
    %129 = arith.cmpi eq, %arg1, %c11_i32 : i32
    %130 = arith.extui %129 : i1 to i32
    %c0_i32_62 = arith.constant 0 : i32
    %131 = arith.cmpi ne, %130, %c0_i32_62 : i32
    scf.if %131 {
      %132 = vector.extract_strided_slice %127 {offsets = [0, 0], sizes = [1, 32], strides = [1, 1]} : vector<8x32xf32> to vector<1x32xf32>
      %133 = arith.truncf %132 : vector<1x32xf32> to vector<1x32xbf16>
      %c0_63 = arith.constant 0 : index
      %c0_64 = arith.constant 0 : index
      %134 = vector.load %arg16[%c0_63, %c0_64] : memref<32x512xbf16, #tpu.memory_space<vmem>>, vector<32x512xbf16>
      %cst_65 = arith.constant dense<0.000000e+00> : vector<1x512xf32>
      %135 = tpu.matmul %133, %134, %cst_65 {dimension_numbers = #tpu.dot_dimension_numbers<[1], [0], [0], [1], [0, 0, 1, 1], [], []>} : vector<1x32xbf16>, vector<32x512xbf16>, vector<1x512xf32> -> vector<1x512xf32>
      %c0_66 = arith.constant 0 : index
      %c0_67 = arith.constant 0 : index
      %136 = vector.load %arg17[%c0_66, %c0_67] : memref<1x512xf32, #tpu.memory_space<vmem>>, vector<1x512xf32>
      %137 = arith.addf %135, %136 : vector<1x512xf32>
      %cst_68 = arith.constant 0.000000e+00 : f32
      %138 = vector.broadcast %cst_68 : f32 to vector<1x512xf32>
      %139 = arith.maximumf %137, %138 : vector<1x512xf32>
      %140 = arith.truncf %139 : vector<1x512xf32> to vector<1x512xbf16>
      %c0_69 = arith.constant 0 : index
      %c0_70 = arith.constant 0 : index
      %141 = vector.load %arg18[%c0_69, %c0_70] : memref<512x128xbf16, #tpu.memory_space<vmem>>, vector<512x128xbf16>
      %cst_71 = arith.constant dense<0.000000e+00> : vector<1x128xf32>
      %142 = tpu.matmul %140, %141, %cst_71 {dimension_numbers = #tpu.dot_dimension_numbers<[1], [0], [0], [1], [0, 0, 1, 1], [], []>} : vector<1x512xbf16>, vector<512x128xbf16>, vector<1x128xf32> -> vector<1x128xf32>
      %c0_72 = arith.constant 0 : index
      %c0_73 = arith.constant 0 : index
      %143 = vector.load %arg19[%c0_72, %c0_73] : memref<1x128xf32, #tpu.memory_space<vmem>>, vector<1x128xf32>
      %144 = arith.addf %142, %143 : vector<1x128xf32>
      %c0_74 = arith.constant 0 : index
      %c0_75 = arith.constant 0 : index
      %c0_76 = arith.constant 0 : index
      %145 = vector.load %arg20[%c0_74, %c0_75, %c0_76] : memref<1x1x128xf32, #tpu.memory_space<vmem>>, vector<1x1x128xf32>
      %146 = vector.shape_cast %145 : vector<1x1x128xf32> to vector<1x128xf32>
      %147 = vector.shape_cast %144 : vector<1x128xf32> to vector<1x1x128xf32>
      tpu.vector_store %arg20[%c0_74, %c0_75, %c0_76], %147 {strides = array<i32>} : memref<1x1x128xf32, #tpu.memory_space<vmem>>, vector<1x1x128xf32>,
    } else {
    }
    return
  }
  func.func @transform_0(%arg0: i32, %arg1: i32) -> (i32, i32, i32) {
    %c0_i32 = arith.constant 0 : i32
    %c0_i32_0 = arith.constant 0 : i32
    %c0_i32_1 = arith.constant 0 : i32
    return %arg0, %c0_i32, %c0_i32_0 : i32, i32, i32
  }
  func.func @transform_1(%arg0: i32, %arg1: i32) -> (i32, i32, i32) {
    %c0_i32 = arith.constant 0 : i32
    %c0_i32_0 = arith.constant 0 : i32
    %c0_i32_1 = arith.constant 0 : i32
    return %arg0, %c0_i32, %c0_i32_0 : i32, i32, i32
  }
  func.func @transform_2(%arg0: i32, %arg1: i32) -> (i32, i32, i32) {
    %c0_i32 = arith.constant 0 : i32
    %c0_i32_0 = arith.constant 0 : i32
    %c0_i32_1 = arith.constant 0 : i32
    return %arg1, %c0_i32, %c0_i32_0 : i32, i32, i32
  }
  func.func @transform_3(%arg0: i32, %arg1: i32) -> (i32, i32, i32) {
    %c0_i32 = arith.constant 0 : i32
    %c0_i32_0 = arith.constant 0 : i32
    %c0_i32_1 = arith.constant 0 : i32
    return %arg1, %c0_i32, %c0_i32_0 : i32, i32, i32
  }
  func.func @transform_4(%arg0: i32, %arg1: i32) -> (i32, i32, i32) {
    %c0_i32 = arith.constant 0 : i32
    %c0_i32_0 = arith.constant 0 : i32
    %c0_i32_1 = arith.constant 0 : i32
    return %arg1, %c0_i32, %c0_i32_0 : i32, i32, i32
  }
  func.func @transform_5(%arg0: i32, %arg1: i32) -> (i32, i32, i32) {
    %c0_i32 = arith.constant 0 : i32
    %c0_i32_0 = arith.constant 0 : i32
    %c0_i32_1 = arith.constant 0 : i32
    return %arg1, %c0_i32, %c0_i32_0 : i32, i32, i32
  }
  func.func @transform_6(%arg0: i32, %arg1: i32) -> (i32, i32, i32) {
    %c0_i32 = arith.constant 0 : i32
    %c0_i32_0 = arith.constant 0 : i32
    %c0_i32_1 = arith.constant 0 : i32
    return %arg1, %c0_i32, %c0_i32_0 : i32, i32, i32
  }
  func.func @transform_7(%arg0: i32, %arg1: i32) -> (i32, i32, i32) {
    %c0_i32 = arith.constant 0 : i32
    %c0_i32_0 = arith.constant 0 : i32
    %c0_i32_1 = arith.constant 0 : i32
    return %arg1, %c0_i32, %c0_i32_0 : i32, i32, i32
  }
  func.func @transform_8(%arg0: i32, %arg1: i32) -> (i32, i32, i32) {
    %c0_i32 = arith.constant 0 : i32
    %c0_i32_0 = arith.constant 0 : i32
    %c0_i32_1 = arith.constant 0 : i32
    return %arg1, %c0_i32, %c0_i32_0 : i32, i32, i32
  }
  func.func @transform_9(%arg0: i32, %arg1: i32) -> (i32, i32, i32) {
    %c0_i32 = arith.constant 0 : i32
    %c0_i32_0 = arith.constant 0 : i32
    %c0_i32_1 = arith.constant 0 : i32
    return %arg1, %c0_i32, %c0_i32_0 : i32, i32, i32
  }
  func.func @transform_10(%arg0: i32, %arg1: i32) -> (i32, i32, i32) {
    %c0_i32 = arith.constant 0 : i32
    %c0_i32_0 = arith.constant 0 : i32
    %c0_i32_1 = arith.constant 0 : i32
    return %arg1, %c0_i32, %c0_i32_0 : i32, i32, i32
  }
  func.func @transform_11(%arg0: i32, %arg1: i32) -> (i32, i32, i32) {
    %c0_i32 = arith.constant 0 : i32
    %c0_i32_0 = arith.constant 0 : i32
    %c0_i32_1 = arith.constant 0 : i32
    return %arg1, %c0_i32, %c0_i32_0 : i32, i32, i32
  }
  func.func @transform_12(%arg0: i32, %arg1: i32) -> (i32, i32, i32) {
    %c0_i32 = arith.constant 0 : i32
    %c0_i32_0 = arith.constant 0 : i32
    %c0_i32_1 = arith.constant 0 : i32
    return %arg1, %c0_i32, %c0_i32_0 : i32, i32, i32
  }
  func.func @transform_13(%arg0: i32, %arg1: i32) -> (i32, i32, i32) {
    %c0_i32 = arith.constant 0 : i32
    %c0_i32_0 = arith.constant 0 : i32
    %c0_i32_1 = arith.constant 0 : i32
    return %arg1, %c0_i32, %c0_i32_0 : i32, i32, i32
  }
  func.func @transform_14(%arg0: i32, %arg1: i32) -> (i32, i32) {
    %c0_i32 = arith.constant 0 : i32
    %c0_i32_0 = arith.constant 0 : i32
    %c0_i32_1 = arith.constant 0 : i32
    return %c0_i32, %c0_i32_0 : i32, i32
  }
  func.func @transform_15(%arg0: i32, %arg1: i32) -> (i32, i32) {
    %c0_i32 = arith.constant 0 : i32
    %c0_i32_0 = arith.constant 0 : i32
    %c0_i32_1 = arith.constant 0 : i32
    return %c0_i32, %c0_i32_0 : i32, i32
  }
  func.func @transform_16(%arg0: i32, %arg1: i32) -> (i32, i32) {
    %c0_i32 = arith.constant 0 : i32
    %c0_i32_0 = arith.constant 0 : i32
    %c0_i32_1 = arith.constant 0 : i32
    return %c0_i32, %c0_i32_0 : i32, i32
  }
  func.func @transform_17(%arg0: i32, %arg1: i32) -> (i32, i32) {
    %c0_i32 = arith.constant 0 : i32
    %c0_i32_0 = arith.constant 0 : i32
    %c0_i32_1 = arith.constant 0 : i32
    return %c0_i32, %c0_i32_0 : i32, i32
  }
  func.func @transform_18(%arg0: i32, %arg1: i32) -> (i32, i32, i32) {
    %c0_i32 = arith.constant 0 : i32
    %c0_i32_0 = arith.constant 0 : i32
    %c0_i32_1 = arith.constant 0 : i32
    return %arg0, %c0_i32, %c0_i32_0 : i32, i32, i32
  }
}

</mosaic_0001>

<bundles_post_ra>
// kernel: tpu_custom_call.1
= control target key start
LH: loop header
LB: loop body
LE: loop exit
PB: predicated region body
PF: predicated region fallthrough
CT: control target
= control target key end

     0   :  { %s5510_s0 = inlined_call_operand.hbm [shape: s32[2,1,8], index: 0, kind: input, shape index: {}]   ;;  %s5511_s1 = inlined_call_operand.vmem [shape: f32[2,8,32], index: 1, kind: input, shape index: {}]   ;;  %s5512_s2 = inlined_call_operand.vmem [shape: bf16[12,32,96], index: 2, kind: input, shape index: {}]   ;;  %s5513_s3 = inlined_call_operand.vmem [shape: f32[12,1,96], index: 3, kind: input, shape index: {}]   ;;  %s5514_s4 = inlined_call_operand.vmem [shape: bf16[12,32,32], index: 4, kind: input, shape index: {}]   ;;  %s5515_s5 = inlined_call_operand.vmem [shape: f32[12,1,32], index: 5, kind: input, shape index: {}]   ;;  %s5516_s6 = inlined_call_operand.vmem [shape: f32[12,1,32], index: 6, kind: input, shape index: {}]   ;;  %s5517_s7 = inlined_call_operand.vmem [shape: f32[12,1,32], index: 7, kind: input, shape index: {}]   ;;  %s5518_s8 = inlined_call_operand.hbm [shape: f32[12,1,32], index: 8, kind: input, shape index: {}]   ;;  %s5519_s9 = inlined_call_operand.hbm [shape: f32[12,1,32], index: 9, kind: input, shape index: {}]   ;;  %s5520_s10 = inlined_call_operand.vmem [shape: bf16[12,32,128], index: 10, kind: input, shape index: {}]   ;;  %s5521_s11 = inlined_call_operand.hbm [shape: f32[12,1,128], index: 11, kind: input, shape index: {}]   ;;  %s5522_s12 = inlined_call_operand.vmem [shape: bf16[12,128,32], index: 12, kind: input, shape index: {}]   ;;  %s5523_s13 = inlined_call_operand.vmem [shape: f32[12,1,32], index: 13, kind: input, shape index: {}]   ;;  %s5524_s14 = inlined_call_operand.vmem [shape: bf16[32,512], index: 14, kind: input, shape index: {}]   ;;  %s5525_s15 = inlined_call_operand.vmem [shape: f32[1,512], index: 15, kind: input, shape index: {}]   ;;  %s5526_s16 = inlined_call_operand.vmem [shape: bf16[512,128], index: 16, kind: input, shape index: {}]   ;;  %s5527_s17 = inlined_call_operand.vmem [shape: f32[1,128], index: 17, kind: input, shape index: {}]   ;;  %s5528_s18 = inlined_call_operand.hbm [shape: f32[2,1,128], index: 18, kind: output, shape index: {}]  }
   0x1   :  { %5548 = sst [smem:[#allocation30_spill]] %s5510_s0 }
   0x2   :  { %5549 = sst [smem:[#allocation31_spill]] %s5511_s1 }
   0x3   :  { %5550 = sst [smem:[#allocation32_spill]] %s5512_s2 }
   0x4   :  { %5551 = sst [smem:[#allocation33_spill]] %s5513_s3 }
   0x5   :  { %5552 = sst [smem:[#allocation34_spill]] %s5514_s4 }
   0x6   :  { %5553 = sst [smem:[#allocation35_spill]] %s5515_s5 }
   0x7   :  { %5554 = sst [smem:[#allocation36_spill]] %s5516_s6 }
   0x8   :  { %5555 = sst [smem:[#allocation37_spill]] %s5517_s7 }
   0x9   :  { %5556 = sst [smem:[#allocation38_spill]] %s5518_s8 }
   0xa   :  { %5557 = sst [smem:[#allocation39_spill]] %s5519_s9 }
   0xb   :  { %5558 = sst [smem:[#allocation40_spill]] %s5520_s10 }
   0xc   :  { %5559 = sst [smem:[#allocation41_spill]] %s5521_s11 }
   0xd   :  { %5560 = sst [smem:[#allocation42_spill]] %s5522_s12 }
   0xe   :  { %5561 = sst [smem:[#allocation43_spill]] %s5523_s13 }
   0xf   :  { %5562 = sst [smem:[#allocation44_spill]] %s5524_s14 }
  0x10   :  { %5563 = sst [smem:[#allocation45_spill]] %s5525_s15 }
  0x11   :  { %5564 = sst [smem:[#allocation46_spill]] %s5526_s16 }
  0x12   :  { %5565 = sst [smem:[#allocation47_spill]] %s5527_s17 }
  0x13   :  { %5566 = sst [smem:[#allocation48_spill]] %s5528_s18 }
  0x14   :  { %23 = vsyncpa [#allocation4], 0 }
  0x15   :  { %25 = vsyncpa [#allocation4 + $0x1], 0 }
  0x16   :  { %26 = vsyncpa [#allocation7], 0 }
  0x17   :  { %28 = vsyncpa [#allocation7 + $0x1], 0 }
  0x18   :  { %29 = vsyncpa [#allocation10], 0 }
  0x19   :  { %31 = vsyncpa [#allocation10 + $0x1], 0 }
  0x1a   :  { %32 = vsyncpa [#allocation5], 0 }
  0x1b   :  { %34 = vsyncpa [#allocation5 + $0x1], 0  ;;  %s4728_s27 = smov 0   ;;  %s4730_s28 = smov 0  }
  0x1c   :  { %s4732_s29 = smov 0   ;;  %s4734_s30 = smov 0  }
  0x1d   :  { %s4736_s0 = smov 0   ;;  %s4738_s19 = smov 0  }
  0x1e   :  { %s4740_s1 = smov 0   ;;  %s4742_s20 = smov 0  }
  0x1f   :  { %s4744_s21 = smov 0   ;;  %s4746_s22 = smov 0  }
  0x20   :  { %s4748_s2 = smov 0  }
  0x21 LB: > { %5567 = sst [smem:[#allocation16_spill]] %s4576_s28  ;;  %s4782_s23 = sadd.s32 4294967295, %s4612_s2   ;;  %s4612_s2 = sphi %s4748_s2, %s40_s2   ;;  %s4608_s22 = sphi %s4746_s22, %s5640_s22   ;;  %s4604_s21 = sphi %s4744_s21, %s5639_s21   ;;  %s4600_s20 = sphi %s4742_s20, %s5638_s20   ;;  %s4596_s1 = sphi %s4740_s1, %s5637_s1   ;;  %s4592_s19 = sphi %s4738_s19, %s5636_s19   ;;  %s4588_s0 = sphi %s4736_s0, %s5635_s0   ;;  %s4584_s30 = sphi %s4734_s30, %s5634_s30   ;;  %s4580_s29 = sphi %s4732_s29, %s5633_s29   ;;  %s4576_s28 = sphi %s4730_s28, %s5632_s28   ;;  %s4572_s27 = sphi %s4728_s27, %s5631_s27  }
  0x22   : > { %5568 = sst [smem:[#allocation17_spill]] %s4580_s29  ;;  %s49_s24 = sadd.s32 1, %s4604_s21 }
  0x23   : > { %5569 = sst [smem:[#allocation18_spill]] %s4584_s30  ;;  %p4785_p0 = scmp.ge.s32.totalorder %s49_s24, 12 }
  0x24   : > { %5570 = sst [smem:[#allocation19_spill]] %s4588_s0  ;;  %p67_p1 = scmp.eq.s32.totalorder %s4612_s2, 0 }
  0x25   : > { %5571 = sst [smem:[#allocation20_spill]] %s4592_s19  ;;  %p5535_p2 = scmp.eq.s32.totalorder %s4782_s23, 0 }
  0x26   : > { %5572 = sst [smem:[#allocation21_spill]] %s4596_s1  ;;  %s267_s26 = sadd.s32 1, %s4580_s29 }
  0x27   : > { %5573 = sst [smem:[#allocation22_spill]] %s4600_s20  ;;  %s5642_s24 = smov (%p4785_p0, %s49_s24), 0 }
  0x28   : > { %5574 = sst [smem:[#allocation23_spill]] %s4604_s21  ;;  %p274_p3 = scmp.ne.s32.totalorder %s4580_s29, %s4576_s28 }
  0x29   : > { %5575 = sst [smem:[#allocation24_spill]] %s4608_s22  ;;  %p280_p4 = scmp.ne.s32.totalorder %s4576_s28, %s4572_s27 }
  0x2a   : > { %5577 = sst [smem:[#allocation25_spill]] %s5642_s24  ;;  %s264_s18 = ssub.s32 %s4604_s21, %s5642_s24 }
  0x2b   : > { %p265_p5 = scmp.eq.s32.totalorder %s264_s18, 0  ;;  %p276_p6 = por %p274_p3, %p67_p1 }
  0x2c   : > { %p4805_p7 = por %p280_p4, %p5535_p2  ;;  %p5534_p8 = scmp.lt.s32.totalorder %s4612_s2, 24 }
  0x2d   : > { %s4811_s15 = scalar_select %p265_p5, %s4580_s29, %s267_s26  }
  0x2e   : > { %s620_s16 = sand.u32 1, %s4612_s2   ;;  %s4815_s14 = sand.u32 1, %s4580_s29  }
  0x2f   : > { %5579 = sst [smem:[#allocation26_spill]] %s4811_s15  ;;  %s4818_s13 = sshll.u32 %s4604_s21, 4 }
  0x30   : > { %s623_s27 = scalar_lea.vmem [#allocation6], %s4815_s14  ;;  %s5580_s8 = sld [smem:[#allocation38_spill]] }
  0x31   : > { %s630_s24 = sshll.u32 %s623_s27, 4  ;;  %p4827_p9 = pnand %p5534_p8, %p276_p6  ;;  %s631_s24 = int_to_ptr.vmem [resolvable:$true] %s630_s24 }
  0x32   : > { %p3890_p10 = scmp.ge.s32.totalorder %s4612_s2, 1  ;;  %p691_p11 = scmp.lt.s32.totalorder %s4612_s2, 25 }
  0x33   : > { %s4833_s26 = scalar_lea.sflag [#allocation7], %s620_s16  ;;  %p5536_p12 = pneg %p4827_p9 }
  0x34   : > { %s4385_s21 = scalar_lea.vmem %s631_s24, 16  ;;  %s4614_s12 = smov [#allocation6]  }
  0x35   : > { %p4386_p13 = scmp.ne.s32.totalorder %s631_s24, %s4385_s21  ;;  %s4390_s27 = sshll.u32 %s4614_s12, 4  ;;  %s4391_s27 = int_to_ptr.vmem [resolvable:$false] %s4390_s27 }
  0x36   : > { %s628_s10 = scalar_lea.hbm %s5580_s8, %s4818_s13  ;;  %s4392_s18 = scalar_lea.vmem %s4391_s27, 32 }
  0x37   : > { %p4388_p3 = pnand %p4386_p13, %p5536_p12  ;;  %p4393_p5 = scmp.lt.s32.totalorder %s631_s24, %s4391_s27 }
  0x38   : > { %p4394_p6 = scmp.lt.s32.totalorder %s4392_s18, %s4385_s21 }
  0x39   : > { %p4389_p4 = pneg %p4388_p3 }
  0x3a   : > { %p4395_p8 = por %p4394_p6, %p4393_p5 }
  0x3c   : > { %p4396_p2 = pnand %p4395_p8, %p4389_p4 }
  0x3e   : > { %4399 = shalt.err (!%p4396_p2)
}
  0x3f   : > { %4176 = dma.hbm_to_vmem [thread:$0]  (!%p4827_p9), %s628_s10, 16, %s631_s24, %s4833_s26  }
  0x40   : > { %p4847_p2 = pnand %p3890_p10, %p691_p11  ;;  %s3883_s21 = sadd.s32 4294967294, %s4612_s2  }
  0x41   : > { %s52_s12 = sadd.s32 1, %s4608_s22  ;;  %s59_s27 = sadd.s32 1, %s4592_s19 }
  0x42   : > { %s5644_s12 = smov (!%p4785_p0, %s52_s12), %s4608_s22  ;;  %p66_p8 = scmp.ne.s32.totalorder %s4592_s19, %s4588_s0 }
  0x43   : > { %p72_p13 = scmp.ne.s32.totalorder %s4588_s0, %s4584_s30  ;;  %p54_p3 = scmp.ge.s32.totalorder %s5644_s12, 2 }
  0x44   : > { %p518_p4 = scmp.eq.s32.totalorder %s4782_s23, 23  ;;  %p4864_p5 = por %p67_p1, %p66_p8 }
  0x45   : > { %p5584_p10 = scmp.eq.s32.totalorder %s4782_s23, 0  ;;  %s5646_s12 = smov (%p54_p3, %s5644_s12), 0 }
  0x46   : > { %5586 = sst [smem:[#allocation27_spill]] %s5646_s12  ;;  %p4876_p0 = por %p518_p4, %p66_p8 }
  0x47   : > { %p4870_p11 = por %p5584_p10, %p72_p13  ;;  %p524_p6 = scmp.eq.s32.totalorder %s3883_s21, 23 }
  0x48   : > { %s5587_s25 = scalar_select %p4876_p0, 1, 0 }
  0x49   : > { %s56_s18 = ssub.s32 %s4608_s22, %s5646_s12  ;;  %s556_s8 = sand.u32 1, %s4592_s19  }
  0x4a   : > { %p57_p1 = scmp.eq.s32.totalorder %s56_s18, 0  ;;  %p4883_p12 = por %p524_p6, %p72_p13 }
  0x4b   : > { %s3886_s30 = sshll.u32 %s4608_s22, 4  ;;  %s559_s6 = scalar_lea.vmem [#allocation3], %s556_s8 }
  0x4c   : > { %s5588_s15 = scalar_select %p4883_p12, 1, 0 }
  0x4d   : > { %s4888_s29 = scalar_select %p57_p1, %s4592_s19, %s59_s27  }
  0x4e   : > { %5589 = sst [smem:[#allocation28_spill]] %s5588_s15  ;;  %s566_s5 = sshll.u32 %s559_s6, 4  ;;  %s567_s5 = int_to_ptr.vmem [resolvable:$true] %s566_s5 }
  0x4f   : > { %5590 = sst [smem:[#allocation29_spill]] %s4888_s29  ;;  %p5592_p8 = scmp.lt.s32.totalorder %s4612_s2, 24 }
  0x50   : > { %s5591_s1 = sld [smem:[#allocation30_spill]]  ;;  %s640_s29 = scalar_lea.vmem [#allocation8], %s4815_s14 }
  0x51   : > { %p4898_p3 = pnand %p5592_p8, %p4864_p5  ;;  %s5594_s9 = sld [smem:[#allocation39_spill]] }
  0x52   : > { %s647_s22 = sshll.u32 %s640_s29, 4  ;;  %s557_s6 = scalar_lea.sflag [#allocation4], %s556_s8  ;;  %s4907_s22 = int_to_ptr.vmem [resolvable:$true] %s647_s22 }
  0x53   : > { %p4402_p13 = pneg %p4898_p3  ;;  %s4413_s3 = scalar_lea.vmem %s567_s5, 16 }
  0x54   : > { %p4414_p4 = scmp.ne.s32.totalorder %s567_s5, %s4413_s3  ;;  %s4615_s4 = smov [#allocation3]  }
  0x56   : > { %s564_s20 = scalar_lea.hbm %s5591_s1, %s3886_s30  ;;  %p4416_p10 = pnand %p4414_p4, %p4402_p13 }
  0x57   : > { %s645_s27 = scalar_lea.hbm %s5594_s9, %s4818_s13  ;;  %s4418_s30 = sshll.u32 %s4615_s4, 4  ;;  %s4419_s30 = int_to_ptr.vmem [resolvable:$false] %s4418_s30 }
  0x58   : > { %p4417_p6 = pneg %p4416_p10  ;;  %s4420_s1 = scalar_lea.vmem %s4419_s30, 32 }
  0x59   : > { %p4421_p5 = scmp.lt.s32.totalorder %s567_s5, %s4419_s30  ;;  %p4422_p1 = scmp.lt.s32.totalorder %s4420_s1, %s4413_s3 }
  0x5b   : > { %p4423_p8 = por %p4422_p1, %p4421_p5 }
  0x5d   : > { %p4424_p12 = pnand %p4423_p8, %p4417_p6 }
  0x5f   : > { %4427 = shalt.err (!%p4424_p12)
}
  0x60   : > { %4173 = dma.hbm_to_vmem [thread:$0]  (!%p4898_p3), %s564_s20, 16, %s567_s5, %s557_s6  }
  0x61   : > { %s4441_s8 = scalar_lea.vmem %s4907_s22, 16  ;;  %p5595_p13 = pneg %p4827_p9 }
  0x62   : > { %p4442_p0 = scmp.ne.s32.totalorder %s4907_s22, %s4441_s8  ;;  %s4616_s29 = smov [#allocation8]  }
  0x63   : > { %s4446_s12 = sshll.u32 %s4616_s29, 4  ;;  %s4447_s12 = int_to_ptr.vmem [resolvable:$false] %s4446_s12 }
  0x64   : > { %p4444_p4 = pnand %p4442_p0, %p5595_p13  ;;  %s4448_s10 = scalar_lea.vmem %s4447_s12, 32 }
  0x65   : > { %p4449_p5 = scmp.lt.s32.totalorder %s4907_s22, %s4447_s12  ;;  %p4450_p6 = scmp.lt.s32.totalorder %s4448_s10, %s4441_s8 }
  0x66   : > { %p4445_p10 = pneg %p4444_p4 }
  0x67   : > { %p4451_p12 = por %p4450_p6, %p4449_p5 }
  0x69   : > { %p4452_p1 = pnand %p4451_p12, %p4445_p10 }
  0x6b   : > { %4455 = shalt.err (!%p4452_p1)
}
  0x6c   : > { %4179 = dma.hbm_to_vmem [thread:$0]  (!%p4827_p9), %s645_s27, 16, %s4907_s22, %s4833_s26  }
  0x6d   : > { %s5596_s11 = sld [smem:[#allocation41_spill]]  ;;  %s665_s3 = scalar_lea.vmem [#allocation9], %s4815_s14 }
  0x6e   : > { %s672_s4 = sshll.u32 %s665_s3, 4  ;;  %s663_s30 = scalar_lea.sflag [#allocation10], %s4815_s14  ;;  %s673_s4 = int_to_ptr.vmem [resolvable:$true] %s672_s4 }
  0x6f   : > { %s4469_s1 = scalar_lea.vmem %s673_s4, 16  ;;  %p5597_p3 = pmov %p5595_p13 }
  0x70   : > { %p4470_p0 = scmp.ne.s32.totalorder %s673_s4, %s4469_s1  ;;  %s4617_s8 = smov [#allocation9]  }
  0x71   : > { %s4474_s29 = sshll.u32 %s4617_s8, 4  ;;  %s4475_s29 = int_to_ptr.vmem [resolvable:$false] %s4474_s29 }
  0x72   : > { %p4472_p8 = pnand %p4470_p0, %p5597_p3  ;;  %s4476_s12 = scalar_lea.vmem %s4475_s29, 32 }
  0x73   : > { %s670_s6 = scalar_lea.hbm %s5596_s11, %s4818_s13  ;;  %p4477_p4 = scmp.lt.s32.totalorder %s673_s4, %s4475_s29 }
  0x74   : > { %p4473_p13 = pneg %p4472_p8  ;;  %p4478_p10 = scmp.lt.s32.totalorder %s4476_s12, %s4469_s1 }
  0x76   : > { %p4479_p5 = por %p4478_p10, %p4477_p4 }
  0x78   : > { %p4480_p6 = pnand %p4479_p5, %p4473_p13 }
  0x7a   : > { %4483 = shalt.err (!%p4480_p6)
}
  0x7b   : > { %4182 = dma.hbm_to_vmem [thread:$0]  (!%p4827_p9), %s670_s6, 16, %s673_s4, %s663_s30  }
  0x7c   : > { %695 = sbr.rel (%p4847_p2) target bundleno = 3670 (0xe56), region = 92  ;;  %s4942_s13 = sand.u32 (!%p4847_p2), 1, %s4588_s0  }
  0x7d   : > { %s698_s14 = scalar_lea.sflag (!%p4847_p2), [#allocation4], %s4942_s13 }
  0x81   : > { %4555 = dma.done.wait (%p4870_p11), %s698_s14, 16  }
  0x82   : > { %4557 = vsyncadd (%p4870_p11), %s698_s14, 4294967280  ;;  %s705_s22 = sand.u32 1, %s4782_s23   ;;  %s4951_s7 = sand.u32 1, %s4576_s28  }
  0x83   : > { %s706_s26 = scalar_lea.sflag [#allocation7], %s705_s22 }
  0x84   : > { %4559 = dma.done.wait (%p4805_p7), %s706_s26, 32  }
  0x85   : > { %4561 = vsyncadd (%p4805_p7), %s706_s26, 4294967264  ;;  %s722_s27 = scalar_lea.sflag [#allocation10], %s4951_s7 }
  0x86   : > { %4563 = dma.done.wait (%p4805_p7), %s722_s27, 16  }
  0x87   : > { %4565 = vsyncadd (%p4805_p7), %s722_s27, 4294967280  ;;  %s5598_s23 = sld [smem:[#allocation22_spill]]  ;;  %s825_s18 = scalar_lea.vmem [#allocation11], %s4942_s13 }
  0x88   : > { %s5599_s5 = sld [smem:[#allocation21_spill]] }
  0x89   : > { %s5600_s6 = sld [smem:[#allocation31_spill]] }
  0x8a   : > { %s5601_s8 = sld [smem:[#allocation32_spill]] }
  0x8b   : > { %s5603_s24 = sld [smem:[#allocation34_spill]] }
  0x8c   : > { %s5604_s11 = sld [smem:[#allocation35_spill]] }
  0x8d   : > { %p826_p9 = scmp.lt.s32.totalorder %s5598_s23, 1  ;;  %s5607_s14 = sld [smem:[#allocation40_spill]] }
  0x8e   : > { %p830_p2 = scmp.lt.s32.totalorder %s5599_s5, 11  ;;  %s5608_s26 = sld [smem:[#allocation42_spill]] }
  0x8f   : > { %s5648_s23 = smov (!%p826_p9, %s5598_s23), 1  ;;  %p3900_p7 = scmp.ne.s32.totalorder %s5599_s5, 0 }
  0x90   : > { %s4969_s20 = scalar_select %p830_p2, %s5599_s5, 11 }
  0x91   : > { %s3891_s21 = sshll.u32 %s5648_s23, 3  ;;  %s5609_s23 = sld [smem:[#allocation43_spill]] }
  0x92   : > { %s829_s3 = scalar_lea.vmem %s5600_s6, %s3891_s21  ;;  %s3986_s4 = sshll.u32 %s4969_s20, 4 }
  0x93   : > { %s4978_s29 = scalar_lea.vmem %s5601_s8, %s3986_s4  ;;  %s4987_s16 = scalar_lea.vmem %s5603_s24, %s3986_s4 }
  0x94   : > { %s845_s17 = scalar_lea.vmem %s5604_s11, %s4969_s20  ;;  %s5605_s6 = sld [smem:[#allocation36_spill]] }
  0x95   : > { %s5606_s8 = sld [smem:[#allocation37_spill]]  ;;  %s5004_s22 = scalar_lea.vmem %s5607_s14, %s3986_s4 }
  0x96   : > { %s3989_s10 = sshll.u32 %s4969_s20, 6 }
  0x97   : > { %s5010_s15 = scalar_lea.vmem %s5608_s26, %s3989_s10  ;;  %s864_s21 = scalar_lea.vmem %s5609_s23, %s4969_s20 }
  0x98   : > { %869 = sbr.rel (%p3900_p7) target bundleno = 159 (0x9f), region = 112 }
  0x9a   : > { %s848_s19 = scalar_lea.vmem %s5605_s6, %s4969_s20 }
  0x9b   : > { %s851_s0 = scalar_lea.vmem %s5606_s8, %s4969_s20 }
  0x9d   : > { %v870_v0 = vld [vmem:[%s829_s3] sm:$0xff]  ;;  %vm871_vm0 = vcmask 261120  }
  0x9e   : > { %872 = vst.msk [vmem:[#allocation2] sm:$0xff] %vm871_vm0, %v870_v0 }
  0x9f PF: > { %vm876_vm1 = vcmask 261120   ;;  %v4291_v8 = vld [vmem:[%s4978_s29 + $0x8] sm:$0xff]   ;;  %v4618_v9 = vmov 0.0   ;;  %vm4619_vm2 = vmmov 0   ;;  %v4292_v10 = vld [vmem:[%s4978_s29] sm:$0xff]   ;;  %s5612_s1 = sld [smem:[#allocation33_spill]]  ;;  %v988_v34 = vlaneseq }
  0xa0   : > { %4068 = vmatprep.subr.bf16.mxu1 %v4618_v9  ;;  %4072 = vmatprep.mubr.msk.bf16.mxu1 %vm4619_vm2, %v4618_v9  ;;  %v3901_v15 = vld [vmem:[%s848_s19] ss:$0 sm:$0xff]  ;;  %s4620_s19 = smov 104   ;;  %s4622_s12 = smov 112   ;;  %v4624_v32 = vmov 1983009808  }
  0xa1   : > { %4069 = vmatpush3.bf16.msra.mxu1 %v4291_v8  ;;  %4088 = vmatprep.subr.bf16.mxu0 %v4618_v9  ;;  %v3902_v17 = vld [vmem:[%s851_s0] ss:$0 sm:$0xff]  ;;  %s4621_s0 = smov 120   ;;  %s4623_s14 = smov 96   ;;  %v986_v33 = vunpack.c.l.s4 %v4624_v32  ;;  %v5069_v37 = vshrl.u32 %v988_v34, 7  ;;  %vm1718_vm3 = vcmask 1043456  }
  0xa2   : > { %4070 = vmatprep.subr.bf16.mxu1 %v4618_v9  ;;  %4090 = vmatprep.mubr.msk.bf16.mxu0 %vm4619_vm2, %v4618_v9  ;;  %v4625_v38 = vmov 1934713408   ;;  %s4627_s10 = smov 64   ;;  %vm1714_vm4 = vcmask 64512   ;;  %s4629_s24 = smov 8   ;;  %vm2835_vm5 = vcmask 130048  }
  0xa3   : > { %v987_v36 = vunpack.c.0.s8 %v986_v33  ;;  %v1018_v39 = vunpack.c.l.s4 %v4625_v38  ;;  %s4630_s27 = smov 24   ;;  %vm2837_vm6 = vcmask 195584   ;;  %s5616_s28 = scalar_lea.vmem [#allocation8], %s4951_s7 }
  0xa4   : > { %s5619_s3 = sld [smem:[#allocation21_spill]] }
  0xa5   : > { %v873_v1 = vld [vmem:[#allocation2] sm:$0xff]  ;;  %4071 = vmatpush3.bf16.msra.mxu1 %v4292_v10  ;;  %s5613_s8 = scalar_lea.vmem %s5612_s1, %s4969_s20  ;;  %v5072_v41 = vsub.s32 %v987_v36, %v5069_v37  ;;  %v1019_v43 = vunpack.c.0.s8 %v1018_v39 }
  0xa6   : > { %v877_v2 = vsel %vm876_vm1, %v873_v1, 0.0  ;;  %4076 = vmatprep.subr.bf16.mxu1 %v4618_v9  ;;  %v3903_v21 = vld [vmem:[%s5613_s8] ss:$0 sm:$0xff] }
  0xa7   : > { %878 = vadd.xlane.f32.xlu0 %v877_v2  ;;  %v5078_v51 = vsub.s32 %v1019_v43, %v5069_v37 }
  0xaa   : > { %p3940_p11 = scmp.ne.s32.totalorder %s5619_s3, 11 }
  0xab   : > { %s5620_s26 = sld [smem:[#allocation44_spill]] (!%p3940_p11) }
  0xac   : > { %s5621_s23 = sld [smem:[#allocation46_spill]] (!%p3940_p11) }
  0xad   : > { %s5622_s8 = sld [smem:[#allocation45_spill]] (!%p3940_p11) }
 0x130   : > { %v879_v3 = vpop.xlane.xlu0 %878 }
 0x131   : > { %v881_v4 = vmul.f32 0.03125, %v879_v3 }
 0x133   : > { %v882_v5 = vsub.f32 %v873_v1, %v881_v4 }
 0x135   : > { %v883_v6 = vmul.f32 %v882_v5, %v882_v5 }
 0x137   : > { %v884_v7 = vsel %vm876_vm1, %v883_v6, 0.0 }
 0x138   : > { %885 = vadd.xlane.f32.xlu0 %v884_v7 }
 0x1c1   : > { %v886_v11 = vpop.xlane.xlu0 %885 }
 0x1c2   : > { %v887_v12 = vmul.f32 0.03125, %v886_v11 }
 0x1c4   : > { %v888_v13 = vadd.f32 1e-05, %v887_v12 }
 0x1c6   : > { %4305 = vrsqrt.f32 %v888_v13 }
 0x1d3   : > { %v4306_v14 = vpop.eup %4305 }
 0x1d4   : > { %v890_v16 = vmul.f32 %v4306_v14, %v882_v5 }
 0x1d6   : > { %v897_v18 = vmul.f32 %v3901_v15, %v890_v16 }
 0x1d8   : > { %v904_v19 = vadd.f32 %v3902_v17, %v897_v18 }
 0x1da   : > { %v905_v20 = vpack.c.bf16 %v904_v19, %v904_v19 }
 0x1dc   : > { %4073 = vmatmul.mubr.msk.bf16.vlgmr.msra.gmra.mxu1 %vm876_vm1, %v905_v20 }
 0x1dd   : > { %4078 = vmatprep.mubr.msk.bf16.mxu1 %vm4619_vm2, %v4618_v9 }
 0x29c   : > { %v966_v22 = vpop.f32.mrf.mxu1 }
 0x29d   : > { %v5048_v23 = vadd.f32 %v3903_v21, %v966_v22 }
 0x29e   : > { %v4074_v24 = vpop.f32.mrf.mxu1 }
 0x29f   : > { %1056 = vrot.lane.b32.xlu0 %v5048_v23, %s4620_s19  ;;  %1052 = vrot.lane.b32.xlu1 %v5048_v23, %s4621_s0  ;;  %v5066_v30 = vmul.f32 0.35355338, %v5048_v23 }
 0x2a0   : > { %v969_v25 = vpop.f32.mrf.mxu1 }
 0x2a2   : > { %v4075_v26 = vpop.f32.mrf.mxu1 }
 0x2a3   : > { %1054 = vrot.lane.b32.xlu1 %v5048_v23, %s4622_s12 }
 0x2a7   : > { %1058 = vrot.lane.b32.xlu1 %v5048_v23, %s4623_s14 }
 0x311   : > { %v5056_v27 = vpop.permute.xlu1 %1052  ;;  %v5062_v29 = vpop.permute.xlu0 %1056 }
 0x312   : > { %1060 = vrot.lane.b32.xlu1 %v5056_v27, %s4623_s14 }
 0x315   : > { %v5059_v28 = vpop.permute.xlu1 %1054 }
 0x316   : > { %1062 = vrot.lane.b32.xlu1 %v5059_v28, %s4623_s14 }
 0x319   : > { %v1059_v31 = vpop.permute.xlu1 %1058 }
 0x31a   : > { %1064 = vrot.lane.b32.xlu1 %v5062_v29, %s4623_s14 }
 0x31e   : > { %974 = vrot.lane.b32.xlu1 %v5066_v30, %s4621_s0 }
 0x384   : > { %v1061_v35 = vpop.permute.xlu1 %1060 }
 0x388   : > { %v1063_v40 = vpop.permute.xlu1 %1062 }
 0x389   : > { %v1070_v42 = vcombine.low %v1059_v31, %v1063_v40  ;;  %v1071_v45 = vcombine.high %v1059_v31, %v1063_v40 }
 0x38b   : > { %v1078_v48 = vrot.slane %v1070_v42, %v5072_v41  ;;  %v1085_v52 = vrot.slane %v1071_v45, %v5072_v41 }
 0x38c   : > { %v1065_v44 = vpop.permute.xlu1 %1064 }
 0x38d   : > { %v1086_v46 = vcombine.low %v1061_v35, %v1065_v44  ;;  %v1087_v47 = vcombine.high %v1061_v35, %v1065_v44 }
 0x38f   : > { %v1094_v49 = vrot.slane %v1086_v46, %v5072_v41  ;;  %v1101_v50 = vrot.slane %v1087_v47, %v5072_v41  ;;  %v4626_v46 = vmov 0  }
 0x390   : > { %v5093_v10 = vpop.permute.xlu1 %974 }
 0x391   : > { %v1102_v53 = vcombine.low %v1078_v48, %v1094_v49  ;;  %v1103_v54 = vcombine.high %v1078_v48, %v1094_v49  ;;  %v1118_v57 = vcombine.low %v1085_v52, %v1101_v50  ;;  %v1119_v63 = vcombine.high %v1085_v52, %v1101_v50 }
 0x393   : > { %v1110_v55 = vrot.slane %v1102_v53, %v5078_v51  ;;  %v1117_v56 = vrot.slane %v1103_v54, %v5078_v51  ;;  %v1126_v62 = vrot.slane %v1118_v57, %v5078_v51  ;;  %v1133_v3 = vrot.slane %v1119_v63, %v5078_v51 }
 0x395   : > { %v1226_v58 = vpack.c.bf16 %v1110_v55, %v1110_v55  ;;  %v1134_v59 = vcombine.high %v1110_v55, %v4618_v9  ;;  %v1135_v61 = vcombine.high %v1117_v56, %v4618_v9  ;;  %v1228_v0 = vpack.c.bf16 %v1117_v56, %v1117_v56 }
 0x396   : > { %v1136_v2 = vcombine.high %v1126_v62, %v4618_v9  ;;  %v1230_v4 = vpack.c.bf16 %v1126_v62, %v1126_v62  ;;  %v1137_v6 = vcombine.high %v1133_v3, %v4618_v9  ;;  %v1232_v7 = vpack.c.bf16 %v1133_v3, %v1133_v3 }
 0x397   : > { %1296 = vxpose.xlu1.c.b16.start.end [1/1] (short) (narrow) %v1226_v58, 16  ;;  %v1227_v60 = vpack.c.bf16 %v1134_v59, %v1134_v59  ;;  %v1229_v1 = vpack.c.bf16 %v1135_v61, %v1135_v61 }
 0x398   : > { %v1231_v5 = vpack.c.bf16 %v1136_v2, %v1136_v2  ;;  %v1233_v8 = vpack.c.bf16 %v1137_v6, %v1137_v6 }
 0x399   : > { %1312 = vxpose.xlu0.c.b16.start.end [1/1] (short) (narrow) %v1227_v60, 16 }
 0x39b   : > { %1328 = vxpose.xlu1.c.b16.start.end [1/1] (short) (narrow) %v1228_v0, 16 }
 0x39d   : > { %1344 = vxpose.xlu0.c.b16.start.end [1/1] (short) (narrow) %v1229_v1, 16 }
 0x39f   : > { %1360 = vxpose.xlu1.c.b16.start.end [1/1] (short) (narrow) %v1230_v4, 16 }
 0x3a1   : > { %1376 = vxpose.xlu0.c.b16.start.end [1/1] (short) (narrow) %v1231_v5, 16 }
 0x3a3   : > { %1392 = vxpose.xlu1.c.b16.start.end [1/1] (short) (narrow) %v1232_v7, 16 }
 0x3a5   : > { %1408 = vxpose.xlu0.c.b16.start.end [1/1] (short) (narrow) %v1233_v8, 16 }
 0x3a7   : > { %980 = vrot.lane.b32.xlu1 %v5066_v30, %s4620_s19 }
 0x3ae   : > { %977 = vrot.lane.b32.xlu0 %v5066_v30, %s4622_s12  ;;  %s5623_s12 = sld [smem:[#allocation47_spill]] (!%p3940_p11) }
 0x3f9   : > { %v1304_v11 = vpop.trf.xlu1 }
 0x3fb   : > { %v1320_v12 = vpop.trf.xlu0 }
 0x3fd   : > { %v1336_v13 = vpop.trf.xlu1 }
 0x3ff   : > { %v1352_v14 = vpop.trf.xlu0 }
 0x401   : > { %v1368_v15 = vpop.trf.xlu1 }
 0x402   : > { %v1424_v17 = vcombine.low %v1304_v11, %v1368_v15 }
 0x403   : > { %v1384_v16 = vpop.trf.xlu0 }
 0x404   : > { %v1458_v19 = vcombine.low %v1320_v12, %v1384_v16  ;;  %v1431_v22 = vrot.slane %v1424_v17, %v5072_v41 }
 0x405   : > { %v1400_v18 = vpop.trf.xlu1 }
 0x406   : > { %v1432_v20 = vcombine.low %v1336_v13, %v1400_v18  ;;  %v1465_v26 = vrot.slane %v1458_v19, %v5072_v41 }
 0x407   : > { %v1416_v21 = vpop.trf.xlu0 }
 0x408   : > { %v1439_v24 = vrot.slane %v1432_v20, %v5072_v41  ;;  %v1466_v25 = vcombine.low %v1352_v14, %v1416_v21 }
 0x40a   : > { %v1440_v31 = vcombine.low %v1431_v22, %v1439_v24  ;;  %v1441_v32 = vcombine.high %v1431_v22, %v1439_v24  ;;  %v1473_v33 = vrot.slane %v1466_v25, %v5072_v41 }
 0x40c   : > { %v1474_v34 = vcombine.low %v1465_v26, %v1473_v33  ;;  %v1475_v35 = vcombine.high %v1465_v26, %v1473_v33  ;;  %v1448_v36 = vrot.slane %v1440_v31, %v5078_v51  ;;  %v1455_v38 = vrot.slane %v1441_v32, %v5078_v51 }
 0x40e   : > { %v1482_v39 = vrot.slane %v1474_v34, %v5078_v51  ;;  %v1489_v40 = vrot.slane %v1475_v35, %v5078_v51  ;;  %v1496_v48 = vshrl.u32 %v1448_v36, 16  ;;  %v1512_v49 = vshrl.u32 %v1455_v38, 16 }
 0x40f   : > { %v1456_v50 = vcombine.high %v1448_v36, %v4626_v46  ;;  %v1457_v57 = vcombine.high %v1455_v38, %v4626_v46 }
 0x410   : > { %v1510_v42 = vpack.i.b16 %v1489_v40, %v1455_v38  ;;  %v1494_v43 = vpack.i.b16 %v1482_v39, %v1448_v36  ;;  %v1497_v44 = vshrl.u32 %v1482_v39, 16  ;;  %v1513_v45 = vshrl.u32 %v1489_v40, 16 }
 0x411   : > { %v1490_v47 = vcombine.high %v1482_v39, %v4626_v46  ;;  %v1491_v55 = vcombine.high %v1489_v40, %v4626_v46  ;;  %v1504_v56 = vshrl.u32 %v1456_v50, 16  ;;  %v1520_v61 = vshrl.u32 %v1457_v57, 16 }
 0x412   : > { %1588 = vxpose.xlu0.c.b16.start.end [1/1] (short) (narrow) %v1510_v42, 16  ;;  %1524 = vxpose.xlu1.c.b16.start.end [1/1] (short) (narrow) %v1494_v43, 16  ;;  %v1498_v52 = vpack.i.b16 %v1497_v44, %v1496_v48  ;;  %v1514_v53 = vpack.i.b16 %v1513_v45, %v1512_v49 }
 0x413   : > { %v1505_v54 = vshrl.u32 %v1490_v47, 16  ;;  %v1502_v59 = vpack.i.b16 %v1490_v47, %v1456_v50  ;;  %v1521_v60 = vshrl.u32 %v1491_v55, 16  ;;  %v1518_v63 = vpack.i.b16 %v1491_v55, %v1457_v57 }
 0x415   : > { %v1506_v58 = vpack.i.b16 %v1505_v54, %v1504_v56  ;;  %v1522_v62 = vpack.i.b16 %v1521_v60, %v1520_v61 }
 0x416   : > { %1540 = vxpose.xlu0.c.b16.start.end [1/1] (short) (narrow) %v1498_v52, 16  ;;  %1604 = vxpose.xlu1.c.b16.start.end [1/1] (short) (narrow) %v1514_v53, 16 }
 0x419   : > { %v981_v1 = vpop.permute.xlu1 %980 }
 0x41a   : > { %1572 = vxpose.xlu1.c.b16.start.end [1/1] (short) (narrow) %v1506_v58, 16  ;;  %1556 = vxpose.xlu0.c.b16.start.end [1/1] (short) (narrow) %v1502_v59, 16  ;;  %v999_v4 = vcombine.low %v5093_v10, %v981_v1  ;;  %v1000_v5 = vcombine.high %v5093_v10, %v981_v1 }
 0x41c   : > { %v1007_v8 = vrot.slane %v999_v4, %v5072_v41 }
 0x41e   : > { %1636 = vxpose.xlu1.c.b16.start.end [1/1] (short) (narrow) %v1522_v62, 16  ;;  %1620 = vxpose.xlu0.c.b16.start.end [1/1] (short) (narrow) %v1518_v63, 16 }
 0x420   : > { %v978_v0 = vpop.permute.xlu0 %977 }
 0x421   : > { %v983_v2 = vcombine.low %v5066_v30, %v978_v0  ;;  %v984_v3 = vcombine.high %v5066_v30, %v978_v0 }
 0x422   : > { %1140 = vrot.lane.b32.xlu1 %v5056_v27, %s4627_s10  ;;  %v1014_v27 = vrot.slane %v1000_v5, %v5072_v41 }
 0x423   : > { %v991_v6 = vrot.slane %v983_v2, %v5072_v41  ;;  %v998_v7 = vrot.slane %v984_v3, %v5072_v41 }
 0x425   : > { %v1015_v11 = vcombine.low %v991_v6, %v1007_v8  ;;  %v1031_v12 = vcombine.low %v998_v7, %v1014_v27  ;;  %v1032_v13 = vcombine.high %v998_v7, %v1014_v27 }
 0x427   : > { %1138 = vrot.lane.b32.xlu0 %v5048_v23, %s4627_s10  ;;  %v1016_v23 = vcombine.high %v991_v6, %v1007_v8  ;;  %v1023_v14 = vrot.slane %v1015_v11, %v5078_v51  ;;  %v1039_v15 = vrot.slane %v1031_v12, %v5078_v51  ;;  %v1046_v10 = vrot.slane %v1032_v13, %v5078_v51 }
 0x429   : > { %v1030_v30 = vrot.slane %v1016_v23, %v5078_v51  ;;  %v1047_v18 = vcombine.high %v1023_v14, %v4618_v9  ;;  %v1049_v20 = vcombine.high %v1039_v15, %v4618_v9  ;;  %v1050_v21 = vcombine.high %v1046_v10, %v4618_v9 }
 0x42a   : > { %v3907_v31 = vpack.c.bf16 %v1039_v15, %v1023_v14 }
 0x42b   : > { %v1048_v19 = vcombine.high %v1030_v30, %v4618_v9  ;;  %v3909_v25 = vpack.c.bf16 %v1049_v20, %v1047_v18  ;;  %v3908_v32 = vpack.c.bf16 %v1046_v10, %v1030_v30 }
 0x42c   : > { %v1241_v40 = vrot.slane %v3907_v31, %v5072_v41 }
 0x42d   : > { %v3910_v26 = vpack.c.bf16 %v1050_v21, %v1048_v19  ;;  %v1266_v35 = vrot.slane %v3909_v25, %v5072_v41  ;;  %v1249_v42 = vrot.slane %v3908_v32, %v5072_v41 }
 0x42f   : > { %v1274_v36 = vrot.slane %v3910_v26, %v5072_v41  ;;  %v1250_v54 = vcombine.low %v1241_v40, %v1249_v42 }
 0x431   : > { %v1275_v48 = vcombine.low %v1266_v35, %v1274_v36  ;;  %v1257_v60 = vrot.slane %v1250_v54, %v5078_v51 }
 0x433   : > { %v1282_v59 = vrot.slane %v1275_v48, %v5078_v51  ;;  %v1258_v8 = vcombine.high %v1257_v60, %v4626_v46  ;;  %v1287_v14 = vshrl.u32 %v1257_v60, 16 }
 0x435   : > { %v1283_v4 = vcombine.high %v1282_v59, %v4626_v46  ;;  %v1286_v7 = vpack.i.b16 %v1282_v59, %v1257_v60  ;;  %v1288_v13 = vshrl.u32 %v1282_v59, 16 }
 0x437   : > { %v1292_v12 = vpack.i.b16 %v1283_v4, %v1258_v8  ;;  %v1289_v15 = vpack.i.b16 %v1288_v13, %v1287_v14 }
 0x474   : > { %v1596_v16 = vpop.trf.xlu0  ;;  %v1532_v17 = vpop.trf.xlu1 }
 0x475   : > { %v1652_v38 = vcombine.low %v1532_v17, %v1596_v16  ;;  %v1294_v16 = vshrl.u32 %v1283_v4, 16  ;;  %v1293_v17 = vshrl.u32 %v1258_v8, 16 }
 0x477   : > { %v1659_v49 = vrot.slane %v1652_v38, %v5072_v41  ;;  %v1295_v18 = vpack.i.b16 %v1294_v16, %v1293_v17 }
 0x478   : > { %v1548_v22 = vpop.trf.xlu0  ;;  %v1612_v24 = vpop.trf.xlu1 }
 0x479   : > { %v1677_v39 = vcombine.low %v1548_v22, %v1612_v24 }
 0x47b   : > { %v1684_v50 = vrot.slane %v1677_v39, %v5072_v41 }
 0x47c   : > { %v1564_v33 = vpop.trf.xlu0  ;;  %v1580_v34 = vpop.trf.xlu1 }
 0x480   : > { %v1628_v43 = vpop.trf.xlu0  ;;  %v1644_v44 = vpop.trf.xlu1 }
 0x481   : > { %v1660_v45 = vcombine.low %v1564_v33, %v1628_v43  ;;  %v1685_v47 = vcombine.low %v1580_v34, %v1644_v44 }
 0x483   : > { %v1667_v52 = vrot.slane %v1660_v45, %v5072_v41  ;;  %v1692_v53 = vrot.slane %v1685_v47, %v5072_v41 }
 0x485   : > { %v1668_v55 = vcombine.low %v1659_v49, %v1667_v52  ;;  %v1693_v56 = vcombine.low %v1684_v50, %v1692_v53 }
 0x487   : > { %v1675_v57 = vrot.slane %v1668_v55, %v5078_v51  ;;  %v1700_v58 = vrot.slane %v1693_v56, %v5078_v51 }
 0x489   : > { %v1704_v61 = vpack.i.b16 %v1700_v58, %v1675_v57  ;;  %v1676_v62 = vcombine.high %v1675_v57, %v4626_v46  ;;  %v1701_v63 = vcombine.high %v1700_v58, %v4626_v46  ;;  %v1705_v0 = vshrl.u32 %v1675_v57, 16 }
 0x48a   : > { %v1706_v1 = vshrl.u32 %v1700_v58, 16 }
 0x48b   : > { %v1720_v2 = vsel %vm1718_vm3, %v1704_v61, 0  ;;  %v1710_v3 = vpack.i.b16 %v1701_v63, %v1676_v62  ;;  %v1711_v27 = vshrl.u32 %v1676_v62, 16  ;;  %v1712_v11 = vshrl.u32 %v1701_v63, 16 }
 0x48c   : > { %4077 = vmatpush3.bf16.msra.mxu1 %v1720_v2  ;;  %v1707_v5 = vpack.i.b16 %v1706_v1, %v1705_v0 }
 0x48d   : > { %v1812_v6 = vsel %vm1718_vm3, %v1710_v3, 0  ;;  %4082 = vmatprep.subr.bf16.mxu1 %v4618_v9  ;;  %v1713_v30 = vpack.i.b16 %v1712_v11, %v1711_v27 }
 0x48e   : > { %4089 = vmatpush3.bf16.msra.mxu0 %v1812_v6  ;;  %v1766_v23 = vsel %vm1718_vm3, %v1707_v5, 0 }
 0x48f   : > { %4079 = vmatmul.mubr.msk.bf16.vlgmr.msra.gmra.mxu1 %vm1714_vm4, %v1286_v7  ;;  %4100 = vmatprep.subr.bf16.mxu0 %v4618_v9  ;;  %v1858_v10 = vsel %vm1718_vm3, %v1713_v30, 0 }
 0x490   : > { %4083 = vmatpush3.bf16.msra.mxu1 %v1766_v23  ;;  %4084 = vmatprep.mubr.msk.bf16.mxu1 %vm4619_vm2, %v4618_v9 }
 0x491   : > { %4091 = vmatmul.mubr.msk.bf16.vlgmr.msra.gmra.mxu0 %vm1714_vm4, %v1292_v12  ;;  %4094 = vmatprep.subr.bf16.mxu1 %v4618_v9 }
 0x492   : > { %4102 = vmatprep.mubr.msk.bf16.mxu0 %vm4619_vm2, %v4618_v9 }
 0x494   : > { %v1141_v49 = vpop.permute.xlu1 %1140 }
 0x497   : > { %4085 = vmatmul.mubr.msk.bf16.vlgmr.msra.gmra.mxu1 %vm1714_vm4, %v1289_v15 }
 0x498   : > { %4095 = vmatpush3.bf16.msra.mxu1 %v1858_v10  ;;  %4096 = vmatprep.mubr.msk.bf16.mxu1 %vm4619_vm2, %v4618_v9 }
 0x499   : > { %4106 = vmatprep.subr.bf16.mxu1 %v4618_v9  ;;  %v1139_v47 = vpop.permute.xlu0 %1138 }
 0x49f   : > { %4097 = vmatmul.mubr.msk.bf16.vlgmr.msra.gmra.mxu1 %vm1714_vm4, %v1295_v18 }
 0x4a0   : > { %4108 = vmatprep.mubr.msk.bf16.mxu1 %vm4619_vm2, %v4618_v9 }
 0x54f   : > { %v5163_v19 = vpop.f32.mrf.mxu1 }
 0x550   : > { %v1900_v20 = vsel %vm1714_vm4, %v5163_v19, -inf }
 0x551   : > { %v5167_v21 = vpop.f32.mrf.mxu0  ;;  %1901 = vmax.xlane.f32.xlu0 %v1900_v20  ;;  %v4080_v22 = vpop.f32.mrf.mxu1 }
 0x552   : > { %v1906_v26 = vsel %vm1714_vm4, %v5167_v21, -inf }
 0x553   : > { %v1759_v24 = vpop.f32.mrf.mxu1  ;;  %v4092_v25 = vpop.f32.mrf.mxu0 }
 0x555   : > { %v1851_v31 = vpop.f32.mrf.mxu0  ;;  %1907 = vmax.xlane.f32.xlu0 %v1906_v26  ;;  %v4081_v32 = vpop.f32.mrf.mxu1 }
 0x557   : > { %v5171_v33 = vpop.f32.mrf.mxu1  ;;  %v4093_v34 = vpop.f32.mrf.mxu0 }
 0x558   : > { %v1903_v35 = vsel %vm1714_vm4, %v5171_v33, -inf }
 0x559   : > { %1904 = vmax.xlane.f32.xlu1 %v1903_v35  ;;  %v4086_v36 = vpop.f32.mrf.mxu1 }
 0x55b   : > { %v1805_v38 = vpop.f32.mrf.mxu1 }
 0x55d   : > { %v4087_v39 = vpop.f32.mrf.mxu1 }
 0x55f   : > { %v5175_v40 = vpop.f32.mrf.mxu1 }
 0x560   : > { %v1909_v45 = vsel %vm1714_vm4, %v5175_v40, -inf }
 0x561   : > { %v4098_v42 = vpop.f32.mrf.mxu1 }
 0x563   : > { %v1897_v43 = vpop.f32.mrf.mxu1 }
 0x565   : > { %v4099_v44 = vpop.f32.mrf.mxu1 }
 0x56a   : > { %1142 = vrot.lane.b32.xlu1 %v5059_v28, %s4627_s10 }
 0x56b   : > { %1144 = vrot.lane.b32.xlu0 %v5062_v29, %s4627_s10 }
 0x58e   : > { %1910 = vmax.xlane.f32.xlu1 %v1909_v45 }
 0x5da   : > { %v5183_v48 = vpop.xlane.xlu0 %1901 }
 0x5de   : > { %v5185_v50 = vpop.xlane.xlu0 %1907 }
 0x5e2   : > { %v1145_v52 = vpop.permute.xlu0 %1144  ;;  %v5187_v53 = vpop.xlane.xlu1 %1904 }
 0x5e3   : > { %v1166_v54 = vcombine.low %v1141_v49, %v1145_v52  ;;  %v1167_v55 = vcombine.high %v1141_v49, %v1145_v52 }
 0x5e5   : > { %v1174_v29 = vrot.slane %v1166_v54, %v5072_v41  ;;  %v1181_v58 = vrot.slane %v1167_v55, %v5072_v41  ;;  %v1913_v54 = vsub.f32 %v5171_v33, %v5187_v53 }
 0x5e6   : > { %v1143_v56 = vpop.permute.xlu1 %1142 }
 0x5e7   : > { %v1150_v28 = vcombine.low %v1139_v47, %v1143_v56  ;;  %v1151_v57 = vcombine.high %v1139_v47, %v1143_v56  ;;  %v1912_v47 = vsub.f32 %v5163_v19, %v5183_v48 }
 0x5e9   : > { %v1158_v59 = vrot.slane %v1150_v28, %v5072_v41  ;;  %v1165_v60 = vrot.slane %v1151_v57, %v5072_v41 }
 0x5eb   : > { %v1182_v61 = vcombine.low %v1158_v59, %v1174_v29  ;;  %v1183_v62 = vcombine.high %v1158_v59, %v1174_v29  ;;  %v1198_v63 = vcombine.low %v1165_v60, %v1181_v58  ;;  %v1199_v2 = vcombine.high %v1165_v60, %v1181_v58 }
 0x5ec   : > { %v1916_v59 = vmul.f32 1.442695, %v1912_v47  ;;  %v1914_v60 = vsub.f32 %v5167_v21, %v5185_v50 }
 0x5ed   : > { %v1190_v0 = vrot.slane %v1182_v61, %v5078_v51  ;;  %v1197_v1 = vrot.slane %v1183_v62, %v5078_v51  ;;  %v1206_v6 = vrot.slane %v1198_v63, %v5078_v51  ;;  %v1213_v11 = vrot.slane %v1199_v2, %v5078_v51 }
 0x5ee   : > { %v1918_v62 = vmul.f32 1.442695, %v1913_v54  ;;  %4307 = vpow2.f32 %v1916_v59 }
 0x5ef   : > { %v1948_v3 = vpack.c.bf16 %v1190_v0, %v1190_v0  ;;  %v1214_v4 = vcombine.high %v1190_v0, %v4618_v9  ;;  %v1215_v5 = vcombine.high %v1197_v1, %v4618_v9  ;;  %v1216_v27 = vcombine.high %v1206_v6, %v4618_v9 }
 0x5f0   : > { %v1950_v23 = vpack.c.bf16 %v1197_v1, %v1197_v1  ;;  %v1217_v13 = vcombine.high %v1213_v11, %v4618_v9  ;;  %v1952_v14 = vpack.c.bf16 %v1206_v6, %v1206_v6  ;;  %v1954_v15 = vpack.c.bf16 %v1213_v11, %v1213_v11 }
 0x5f1   : > { %1956 = vxpose.xlu1.c.b16.start.end [1/1] (short) (narrow) %v1948_v3, 16  ;;  %v1949_v7 = vpack.c.bf16 %v1214_v4, %v1214_v4  ;;  %v1951_v8 = vpack.c.bf16 %v1215_v5, %v1215_v5  ;;  %v1953_v12 = vpack.c.bf16 %v1216_v27, %v1216_v27  ;;  %v1920_v1 = vmul.f32 1.442695, %v1914_v60 }
 0x5f2   : > { %v1955_v30 = vpack.c.bf16 %v1217_v13, %v1217_v13  ;;  %4309 = vpow2.f32 %v1918_v62 }
 0x5f3   : > { %1972 = vxpose.xlu0.c.b16.start.end [1/1] (short) (narrow) %v1949_v7, 16  ;;  %4311 = vpow2.f32 %v1920_v1 }
 0x5f5   : > { %2004 = vxpose.xlu1.c.b16.start.end [1/1] (short) (narrow) %v1951_v8, 16 }
 0x5f7   : > { %1988 = vxpose.xlu0.c.b16.start.end [1/1] (short) (narrow) %v1950_v23, 16 }
 0x5f9   : > { %2036 = vxpose.xlu1.c.b16.start.end [1/1] (short) (narrow) %v1953_v12, 16 }
 0x5fb   : > { %2020 = vxpose.xlu0.c.b16.start.end [1/1] (short) (narrow) %v1952_v14, 16 }
 0x5fd   : > { %2068 = vxpose.xlu1.c.b16.start.end [1/1] (short) (narrow) %v1955_v30, 16 }
 0x5ff   : > { %2052 = vxpose.xlu0.c.b16.start.end [1/1] (short) (narrow) %v1954_v15, 16 }
 0x617   : > { %v1911_v10 = vpop.xlane.xlu1 %1910 }
 0x618   : > { %v1915_v33 = vsub.f32 %v5175_v40, %v1911_v10  ;;  %v4308_v40 = vpop.eup %4307 }
 0x619   : > { %v4310_v6 = vpop.eup %4309  ;;  %v1924_v7 = vsel %vm1714_vm4, %v4308_v40, 0.0 }
 0x61a   : > { %v1922_v21 = vmul.f32 1.442695, %v1915_v33  ;;  %v4312_v8 = vpop.eup %4311  ;;  %v1927_v27 = vsel %vm1714_vm4, %v4310_v6, 0.0 }
 0x61b   : > { %v1930_v23 = vsel %vm1714_vm4, %v4312_v8, 0.0 }
 0x61c   : > { %4313 = vpow2.f32 %v1922_v21 }
 0x629   : > { %v4314_v11 = vpop.eup %4313 }
 0x62a   : > { %v1933_v12 = vsel %vm1714_vm4, %v4314_v11, 0.0 }
 0x653   : > { %v1964_v16 = vpop.trf.xlu1 }
 0x655   : > { %v1980_v17 = vpop.trf.xlu0 }
 0x657   : > { %v2012_v18 = vpop.trf.xlu1 }
 0x659   : > { %v1996_v20 = vpop.trf.xlu0 }
 0x65b   : > { %v2044_v22 = vpop.trf.xlu1 }
 0x65c   : > { %v2118_v25 = vcombine.low %v1980_v17, %v2044_v22 }
 0x65d   : > { %v2028_v24 = vpop.trf.xlu0 }
 0x65e   : > { %v2084_v31 = vcombine.low %v1964_v16, %v2028_v24  ;;  %v2125_v35 = vrot.slane %v2118_v25, %v5072_v41 }
 0x65f   : > { %v2076_v26 = vpop.trf.xlu1 }
 0x660   : > { %v2126_v32 = vcombine.low %v2012_v18, %v2076_v26  ;;  %v2091_v39 = vrot.slane %v2084_v31, %v5072_v41 }
 0x661   : > { %v2060_v34 = vpop.trf.xlu0 }
 0x662   : > { %v2133_v36 = vrot.slane %v2126_v32, %v5072_v41  ;;  %v2092_v38 = vcombine.low %v1996_v20, %v2060_v34 }
 0x664   : > { %v2134_v42 = vcombine.low %v2125_v35, %v2133_v36  ;;  %v2099_v43 = vrot.slane %v2092_v38, %v5072_v41  ;;  %v2135_v55 = vcombine.high %v2125_v35, %v2133_v36 }
 0x666   : > { %v2100_v44 = vcombine.low %v2091_v39, %v2099_v43  ;;  %v2142_v45 = vrot.slane %v2134_v42, %v5078_v51  ;;  %v2101_v49 = vcombine.high %v2091_v39, %v2099_v43  ;;  %v2149_v0 = vrot.slane %v2135_v55, %v5078_v51 }
 0x668   : > { %v2108_v52 = vrot.slane %v2100_v44, %v5078_v51  ;;  %v2157_v56 = vshrl.u32 %v2142_v45, 16  ;;  %v2150_v58 = vcombine.high %v2142_v45, %v4626_v46  ;;  %v2115_v61 = vrot.slane %v2101_v49, %v5078_v51 }
 0x669   : > { %v2173_v4 = vshrl.u32 %v2149_v0, 16  ;;  %v2151_v14 = vcombine.high %v2149_v0, %v4626_v46 }
 0x66a   : > { %v2154_v28 = vpack.i.b16 %v2142_v45, %v2108_v52  ;;  %v2156_v57 = vshrl.u32 %v2108_v52, 16  ;;  %v2116_v29 = vcombine.high %v2108_v52, %v4626_v46  ;;  %v2165_v63 = vshrl.u32 %v2150_v58, 16 }
 0x66b   : > { %v2172_v3 = vshrl.u32 %v2115_v61, 16  ;;  %v2170_v50 = vpack.i.b16 %v2149_v0, %v2115_v61  ;;  %v2117_v13 = vcombine.high %v2115_v61, %v4626_v46  ;;  %v2181_v10 = vshrl.u32 %v2151_v14, 16 }
 0x66c   : > { %2184 = vxpose.xlu0.c.b16.start.end [1/1] (short) (narrow) %v2154_v28, 16  ;;  %v2158_v19 = vpack.i.b16 %v2157_v56, %v2156_v57  ;;  %v2164_v48 = vshrl.u32 %v2116_v29, 16  ;;  %v2162_v53 = vpack.i.b16 %v2150_v58, %v2116_v29 }
 0x66d   : > { %v2174_v5 = vpack.i.b16 %v2173_v4, %v2172_v3  ;;  %v2180_v30 = vshrl.u32 %v2117_v13, 16  ;;  %v2178_v15 = vpack.i.b16 %v2151_v14, %v2117_v13 }
 0x66e   : > { %2200 = vxpose.xlu1.c.b16.start.end [1/1] (short) (narrow) %v2158_v19, 16  ;;  %v2166_v2 = vpack.i.b16 %v2165_v63, %v2164_v48 }
 0x66f   : > { %v2182_v16 = vpack.i.b16 %v2181_v10, %v2180_v30 }
 0x670   : > { %2216 = vxpose.xlu0.c.b16.start.end [1/1] (short) (narrow) %v2162_v53, 16 }
 0x672   : > { %2232 = vxpose.xlu1.c.b16.start.end [1/1] (short) (narrow) %v2166_v2, 16 }
 0x674   : > { %2248 = vxpose.xlu0.c.b16.start.end [1/1] (short) (narrow) %v2170_v50, 16 }
 0x676   : > { %2264 = vxpose.xlu1.c.b16.start.end [1/1] (short) (narrow) %v2174_v5, 16 }
 0x681   : > { %1925 = vadd.xlane.f32.xlu0 %v1924_v7 }
 0x683   : > { %1928 = vadd.xlane.f32.xlu1 %v1927_v27 }
 0x685   : > { %1931 = vadd.xlane.f32.xlu0 %v1930_v23 }
 0x687   : > { %1934 = vadd.xlane.f32.xlu1 %v1933_v12 }
 0x6b2   : > { %2280 = vxpose.xlu0.c.b16.start.end [1/1] (short) (narrow) %v2178_v15, 16 }
 0x6b4   : > { %2296 = vxpose.xlu1.c.b16.start.end [1/1] (short) (narrow) %v2182_v16, 16 }
 0x6ce   : > { %v2192_v17 = vpop.trf.xlu0 }
 0x6d0   : > { %v2208_v18 = vpop.trf.xlu1 }
 0x6d2   : > { %v2224_v20 = vpop.trf.xlu0 }
 0x6d4   : > { %v2240_v22 = vpop.trf.xlu1 }
 0x6d6   : > { %v2256_v24 = vpop.trf.xlu0 }
 0x6d7   : > { %v2312_v39 = vcombine.low %v2192_v17, %v2256_v24 }
 0x6d8   : > { %v2272_v25 = vpop.trf.xlu1 }
 0x6d9   : > { %v2337_v36 = vcombine.low %v2208_v18, %v2272_v25  ;;  %v2319_v55 = vrot.slane %v2312_v39, %v5072_v41 }
 0x6db   : > { %v2344_v47 = vrot.slane %v2337_v36, %v5072_v41 }
 0x70a   : > { %v1926_v26 = vpop.xlane.xlu0 %1925 }
 0x70b   : > { %4315 = vrcp.f32 %v1926_v26 }
 0x70c   : > { %v1929_v31 = vpop.xlane.xlu1 %1928 }
 0x70d   : > { %4317 = vrcp.f32 %v1929_v31 }
 0x70e   : > { %v1932_v32 = vpop.xlane.xlu0 %1931 }
 0x70f   : > { %4319 = vrcp.f32 %v1932_v32 }
 0x710   : > { %v1935_v34 = vpop.xlane.xlu1 %1934 }
 0x711   : > { %4321 = vrcp.f32 %v1935_v34 }
 0x714   : > { %v2288_v35 = vpop.trf.xlu0 }
 0x715   : > { %v2320_v38 = vcombine.low %v2224_v20, %v2288_v35 }
 0x716   : > { %v2304_v42 = vpop.trf.xlu1 }
 0x717   : > { %v2345_v43 = vcombine.low %v2240_v22, %v2304_v42  ;;  %v2327_v45 = vrot.slane %v2320_v38, %v5072_v41 }
 0x718   : > { %v4316_v44 = vpop.eup %4315 }
 0x719   : > { %v2352_v49 = vrot.slane %v2345_v43, %v5072_v41  ;;  %v1937_v52 = vmul.f32 %v4316_v44, %v4308_v40  ;;  %v2328_v58 = vcombine.low %v2319_v55, %v2327_v45  ;;  %v4293_v55 = vld [vmem:[%s4987_s16 + $0x8] sm:$0xff]  }
 0x71a   : > { %v4318_v54 = vpop.eup %4317 }
 0x71b   : > { %v2353_v56 = vcombine.low %v2344_v47, %v2352_v49  ;;  %v1944_v28 = vpack.c.bf16 %v1937_v52, %v1937_v52  ;;  %v1939_v57 = vmul.f32 %v4318_v54, %v4310_v6  ;;  %v2335_v62 = vrot.slane %v2328_v58, %v5078_v51 }
 0x71c   : > { %v4320_v29 = vpop.eup %4319 }
 0x71d   : > { %v2378_v59 = vsel %vm1714_vm4, %v1944_v28, 0  ;;  %v2360_v19 = vrot.slane %v2353_v56, %v5078_v51  ;;  %v1945_v48 = vpack.c.bf16 %v1939_v57, %v1939_v57  ;;  %v1941_v61 = vmul.f32 %v4320_v29, %v4312_v8 }
 0x71e   : > { %v4322_v60 = vpop.eup %4321  ;;  %4101 = vmatpush3.bf16.xpose.msra.mxu0 %v2378_v59  ;;  %v2365_v2 = vshrl.u32 %v2335_v62, 16  ;;  %v2336_v5 = vcombine.high %v2335_v62, %v4626_v46 }
 0x71f   : > { %4112 = vmatprep.subr.bf16.mxu0 %v4618_v9  ;;  %v2424_v33 = vsel %vm1714_vm4, %v1945_v48, 0  ;;  %v1943_v53 = vmul.f32 %v4322_v60, %v4314_v11  ;;  %v1946_v63 = vpack.c.bf16 %v1941_v61, %v1941_v61  ;;  %v2366_v0 = vshrl.u32 %v2360_v19, 16  ;;  %v4294_v48 = vld [vmem:[%s4987_s16] sm:$0xff]   ;;  %s4628_s16 = smov 16  }
 0x720   : > { %4107 = vmatpush3.bf16.xpose.msra.mxu1 %v2424_v33  ;;  %v2364_v1 = vpack.i.b16 %v2360_v19, %v2335_v62  ;;  %v2361_v50 = vcombine.high %v2360_v19, %v4626_v46  ;;  %v2371_v8 = vshrl.u32 %v2336_v5, 16 }
 0x721   : > { %4118 = vmatprep.subr.bf16.mxu1 %v4618_v9  ;;  %v1947_v3 = vpack.c.bf16 %v1943_v53, %v1943_v53  ;;  %v2470_v21 = vsel %vm1714_vm4, %v1946_v63, 0  ;;  %v2367_v4 = vpack.i.b16 %v2366_v0, %v2365_v2 }
 0x722   : > { %v2372_v6 = vshrl.u32 %v2361_v50, 16  ;;  %v2370_v7 = vpack.i.b16 %v2361_v50, %v2336_v5 }
 0x723   : > { %v2516_v40 = vsel %vm1714_vm4, %v1947_v3, 0 }
 0x724   : > { %v2373_v27 = vpack.i.b16 %v2372_v6, %v2371_v8 }
 0x725   : > { %4103 = vmatmul.mubr.msk.bf16.vlgmr.msra.gmra.mxu0 %vm1714_vm4, %v2364_v1 }
 0x726   : > { %4113 = vmatpush3.bf16.xpose.msra.mxu0 %v2470_v21  ;;  %4114 = vmatprep.mubr.msk.bf16.mxu0 %vm4619_vm2, %v4618_v9 }
 0x727   : > { %4124 = vmatprep.subr.bf16.mxu0 %v4618_v9  ;;  %4109 = vmatmul.mubr.msk.bf16.vlgmr.msra.gmra.mxu1 %vm1714_vm4, %v2367_v4 }
 0x728   : > { %4119 = vmatpush3.bf16.xpose.msra.mxu1 %v2516_v40  ;;  %4120 = vmatprep.mubr.msk.bf16.mxu1 %vm4619_vm2, %v4618_v9 }
 0x729   : > { %4132 = vmatprep.subr.bf16.mxu1 %v4618_v9 }
 0x72d   : > { %4115 = vmatmul.mubr.msk.bf16.vlgmr.msra.gmra.mxu0 %vm1714_vm4, %v2370_v7 }
 0x72e   : > { %4128 = vmatprep.mubr.msk.bf16.mxu0 %vm4619_vm2, %v4618_v9  ;;  %4125 = vmatpush3.bf16.msra.mxu0 %v4293_v55  ;;  %v4300_v55 = vld [vmem:[%s5010_s15 + $0x20] sm:$0xff]  }
 0x72f   : > { %4121 = vmatmul.mubr.msk.bf16.vlgmr.msra.gmra.mxu1 %vm1714_vm4, %v2373_v27  ;;  %4126 = vmatprep.subr.bf16.mxu0 %v4618_v9 }
 0x730   : > { %4136 = vmatprep.mubr.msk.bf16.mxu1 %vm4619_vm2, %v4618_v9 }
 0x732   : > { %4127 = vmatpush3.bf16.msra.mxu0 %v4294_v48 }
 0x733   : > { %4140 = vmatprep.subr.bf16.mxu0 %v4618_v9 }
 0x7e5   : > { %v2414_v46 = vpop.f32.mrf.mxu0 }
 0x7e6   : > { %2558 = vxpose.xlu0.b32.start.end [1/1] (short) (narrow) %v2414_v46, 8 }
 0x7e7   : > { %v4104_v11 = vpop.f32.mrf.mxu0  ;;  %v2460_v23 = vpop.f32.mrf.mxu1 }
 0x7e8   : > { %2590 = vxpose.xlu1.b32.start.end [1/1] (short) (narrow) %v2460_v23, 8 }
 0x7e9   : > { %v2417_v12 = vpop.f32.mrf.mxu0  ;;  %v4110_v13 = vpop.f32.mrf.mxu1 }
 0x7ea   : > { %v3924_v13 = vld [vmem:[%s845_s17] ss:$0 sm:$0xff]  ;;  %s5615_s17 = scalar_lea.vmem [#allocation6], %s4951_s7 }
 0x7eb   : > { %v4105_v14 = vpop.f32.mrf.mxu0  ;;  %v2463_v30 = vpop.f32.mrf.mxu1 }
 0x7ec   : > { %v4327_v14 = vld [vmem:[#allocation2] sm:$0xff] }
 0x7ed   : > { %v2506_v15 = vpop.f32.mrf.mxu0  ;;  %v4111_v10 = vpop.f32.mrf.mxu1 }
 0x7ee   : > { %2622 = vxpose.xlu0.b32.start.end [1/1] (short) (narrow) %v2506_v15, 8 }
 0x7ef   : > { %v4116_v16 = vpop.f32.mrf.mxu0  ;;  %v2552_v17 = vpop.f32.mrf.mxu1 }
 0x7f1   : > { %v2509_v18 = vpop.f32.mrf.mxu0  ;;  %v4122_v20 = vpop.f32.mrf.mxu1 }
 0x7f2   : > { %2654 = vxpose.xlu0.b32.start.end [1/1] (short) (narrow) %v2552_v17, 8 }
 0x7f3   : > { %v4117_v22 = vpop.f32.mrf.mxu0  ;;  %v2555_v24 = vpop.f32.mrf.mxu1 }
 0x7f5   : > { %v4123_v25 = vpop.f32.mrf.mxu1 }
 0x862   : > { %v2574_v26 = vpop.trf.xlu0 }
 0x864   : > { %v2606_v32 = vpop.trf.xlu1 }
 0x86a   : > { %v2638_v31 = vpop.trf.xlu0 }
 0x86b   : > { %v2686_v34 = vcombine.low %v2574_v26, %v2638_v31  ;;  %v2687_v35 = vcombine.high %v2574_v26, %v2638_v31  ;;  %v4295_v31 = vld [vmem:[%s5004_s22 + $0x8] sm:$0xff]  }
 0x86c   : > { %4133 = vmatpush3.bf16.msra.mxu1 %v4295_v31 }
 0x86d   : > { %v2694_v42 = vrot.slane %v2686_v34, %v5072_v41  ;;  %v2701_v43 = vrot.slane %v2687_v35, %v5072_v41  ;;  %4134 = vmatprep.subr.bf16.mxu1 %v4618_v9 }
 0x86e   : > { %v2670_v36 = vpop.trf.xlu0 }
 0x86f   : > { %v2702_v38 = vcombine.low %v2606_v32, %v2670_v36  ;;  %v2703_v39 = vcombine.high %v2606_v32, %v2670_v36  ;;  %v4296_v32 = vld [vmem:[%s5004_s22] sm:$0xff]   ;;  %s5617_s22 = scalar_lea.vmem [#allocation9], %s4951_s7 }
 0x870   : > { %4135 = vmatpush3.bf16.msra.mxu1 %v4296_v32 }
 0x871   : > { %v2710_v44 = vrot.slane %v2702_v38, %v5072_v41  ;;  %v2717_v45 = vrot.slane %v2703_v39, %v5072_v41  ;;  %v3925_v39 = vld [vmem:[%s5615_s17] ss:$0 sm:$0xff] }
 0x873   : > { %v2718_v47 = vcombine.low %v2694_v42, %v2710_v44  ;;  %v2719_v49 = vcombine.high %v2694_v42, %v2710_v44  ;;  %v2734_v52 = vcombine.low %v2701_v43, %v2717_v45  ;;  %v2735_v54 = vcombine.high %v2701_v43, %v2717_v45  ;;  %v3926_v43 = vld [vmem:[%s5616_s28] ss:$0 sm:$0xff] }
 0x875   : > { %v2726_v56 = vrot.slane %v2718_v47, %v5078_v51  ;;  %v2733_v28 = vrot.slane %v2719_v49, %v5078_v51  ;;  %v2742_v57 = vrot.slane %v2734_v52, %v5078_v51  ;;  %v2749_v29 = vrot.slane %v2735_v54, %v5078_v51  ;;  %v4297_v49 = vld [vmem:[%s5010_s15 + $0x38] sm:$0xff]   ;;  %v4298_v52 = vld [vmem:[%s5010_s15 + $0x30] sm:$0xff]   ;;  %v4299_v54 = vld [vmem:[%s5010_s15 + $0x28] sm:$0xff]  }
 0x877   : > { %v2754_v58 = vcombine.low %v2726_v56, %v2733_v28  ;;  %v3919_v59 = vcombine.high %v2726_v56, %v2733_v28  ;;  %v2770_v60 = vcombine.low %v2742_v57, %v2749_v29  ;;  %v3920_v19 = vcombine.high %v2742_v57, %v2749_v29  ;;  %v4301_v56 = vld [vmem:[%s5010_s15 + $0x18] sm:$0xff]   ;;  %v4302_v28 = vld [vmem:[%s5010_s15 + $0x10] sm:$0xff]   ;;  %v4303_v57 = vld [vmem:[%s5010_s15 + $0x8] sm:$0xff]  }
 0x878   : > { %v4304_v29 = vld [vmem:[%s5010_s15] sm:$0xff]  }
 0x879   : > { %v2761_v61 = vrot.slane %v2754_v58, %v5072_v41  ;;  %v2769_v62 = vrot.slane %v3919_v59, %v5072_v41  ;;  %v2777_v33 = vrot.slane %v2770_v60, %v5072_v41  ;;  %v2785_v53 = vrot.slane %v3920_v19, %v5072_v41  ;;  %v3927_v58 = vld [vmem:[%s5617_s22] ss:$0 sm:$0xff] }
 0x87b   : > { %v2787_v63 = vcombine.high %v2761_v61, %v2769_v62  ;;  %v2803_v0 = vcombine.high %v2777_v33, %v2785_v53  ;;  %v2786_v1 = vcombine.low %v2761_v61, %v2769_v62  ;;  %v2802_v2 = vcombine.low %v2777_v33, %v2785_v53 }
 0x87d   : > { %v2801_v3 = vrot.slane %v2787_v63, %v5078_v51  ;;  %v2817_v21 = vrot.slane %v2803_v0, %v5078_v51  ;;  %v2794_v50 = vrot.slane %v2786_v1, %v5078_v51  ;;  %v2810_v4 = vrot.slane %v2802_v2, %v5078_v51 }
 0x87f   : > { %v2820_v5 = vcombine.low %v2801_v3, %v2817_v21  ;;  %v2819_v40 = vcombine.high %v2794_v50, %v2810_v4  ;;  %v2818_v6 = vcombine.low %v2794_v50, %v2810_v4  ;;  %v2821_v41 = vcombine.high %v2801_v3, %v2817_v21  ;;  %v3931_v50 = vld [vmem:[%s864_s21] ss:$0 sm:$0xff] }
 0x881   : > { %2827 = vrot.lane.b32.xlu1 %v2820_v5, %s4628_s16  ;;  %2823 = vrot.lane.b32.xlu0 %v2819_v40, %s4629_s24 }
 0x885   : > { %2831 = vrot.lane.b32.xlu1 %v2821_v41, %s4630_s27 }
 0x8f3   : > { %v2828_v7 = vpop.permute.xlu1 %2827  ;;  %v2824_v8 = vpop.permute.xlu0 %2823 }
 0x8f4   : > { %v2834_v27 = vsel %vm1714_vm4, %v2818_v6, %v2824_v8 }
 0x8f5   : > { %v2836_v11 = vsel %vm2835_vm5, %v2834_v27, %v2828_v7 }
 0x8f7   : > { %v2832_v46 = vpop.permute.xlu1 %2831 }
 0x8f8   : > { %v2838_v51 = vsel %vm2837_vm6, %v2836_v11, %v2832_v46 }
 0x8f9   : > { %v2839_v23 = vpack.c.bf16 %v2838_v51, %v2838_v51 }
 0x8fb   : > { %4129 = vmatmul.mubr.msk.bf16.vlgmr.msra.gmra.mxu0 %vm876_vm1, %v2839_v23 }
 0x8fc   : > { %4156 = vmatprep.mubr.msk.bf16.mxu0 %vm4619_vm2, %v4618_v9  ;;  %4141 = vmatpush3.bf16.msra.mxu0 %v4297_v49 }
 0x8fd   : > { %4142 = vmatprep.subr.bf16.mxu0 %v4618_v9 }
 0x900   : > { %4143 = vmatpush3.bf16.msra.mxu0 %v4298_v52 }
 0x901   : > { %4144 = vmatprep.subr.bf16.mxu0 %v4618_v9 }
 0x904   : > { %4145 = vmatpush3.bf16.msra.mxu0 %v4299_v54 }
 0x905   : > { %4146 = vmatprep.subr.bf16.mxu0 %v4618_v9 }
 0x908   : > { %4147 = vmatpush3.bf16.msra.mxu0 %v4300_v55 }
 0x909   : > { %4148 = vmatprep.subr.bf16.mxu0 %v4618_v9 }
 0x90c   : > { %4149 = vmatpush3.bf16.msra.mxu0 %v4301_v56 }
 0x90d   : > { %4150 = vmatprep.subr.bf16.mxu0 %v4618_v9 }
 0x910   : > { %4151 = vmatpush3.bf16.msra.mxu0 %v4302_v28 }
 0x911   : > { %4152 = vmatprep.subr.bf16.mxu0 %v4618_v9 }
 0x914   : > { %4153 = vmatpush3.bf16.msra.mxu0 %v4303_v57 }
 0x915   : > { %4154 = vmatprep.subr.bf16.mxu0 %v4618_v9 }
 0x918   : > { %4155 = vmatpush3.bf16.msra.mxu0 %v4304_v29 }
 0x9bb   : > { %v2893_v12 = vpop.f32.mrf.mxu0 }
 0x9bc   : > { %v2899_v30 = vadd.f32 %v4327_v14, %v2893_v12 }
 0x9bd   : > { %v4130_v15 = vpop.f32.mrf.mxu0 }
 0x9be   : > { %v5281_v10 = vadd.f32 %v3924_v13, %v2899_v30 }
 0x9bf   : > { %v2896_v16 = vpop.f32.mrf.mxu0 }
 0x9c0   : > { %v2910_v17 = vsel %vm876_vm1, %v5281_v10, 0.0 }
 0x9c1   : > { %2911 = vadd.xlane.f32.xlu1 %v2910_v17  ;;  %v4131_v18 = vpop.f32.mrf.mxu0 }
 0xa4a   : > { %v2912_v20 = vpop.xlane.xlu1 %2911 }
 0xa4b   : > { %v2913_v22 = vmul.f32 0.03125, %v2912_v20 }
 0xa4d   : > { %v2914_v24 = vsub.f32 %v5281_v10, %v2913_v22 }
 0xa4f   : > { %v2915_v25 = vmul.f32 %v2914_v24, %v2914_v24 }
 0xa51   : > { %v2916_v26 = vsel %vm876_vm1, %v2915_v25, 0.0 }
 0xa52   : > { %2917 = vadd.xlane.f32.xlu0 %v2916_v26 }
 0xadb   : > { %v2918_v34 = vpop.xlane.xlu0 %2917 }
 0xadc   : > { %v2919_v35 = vmul.f32 0.03125, %v2918_v34 }
 0xade   : > { %v2920_v36 = vadd.f32 1e-05, %v2919_v35 }
 0xae0   : > { %4323 = vrsqrt.f32 %v2920_v36 }
 0xaed   : > { %v4324_v38 = vpop.eup %4323 }
 0xaee   : > { %v2922_v42 = vmul.f32 %v4324_v38, %v2914_v24 }
 0xaf0   : > { %v2929_v44 = vmul.f32 %v3925_v39, %v2922_v42 }
 0xaf2   : > { %v2936_v45 = vadd.f32 %v3926_v43, %v2929_v44 }
 0xaf4   : > { %v2937_v47 = vpack.c.bf16 %v2936_v45, %v2936_v45 }
 0xaf6   : > { %4137 = vmatmul.mubr.msk.bf16.vlgmr.msra.gmra.mxu1 %vm876_vm1, %v2937_v47 }
 0xbb6   : > { %v2998_v59 = vpop.f32.mrf.mxu1 }
 0xbb7   : > { %v2999_v60 = vadd.f32 %v3927_v58, %v2998_v59 }
 0xbb8   : > { %v4138_v19 = vpop.f32.mrf.mxu1 }
 0xbb9   : > { %v3005_v48 = vmul.f32 0.044715, %v2999_v60  ;;  %v3004_v2 = vmul.f32 0.5, %v2999_v60 }
 0xbba   : > { %v3001_v61 = vpop.f32.mrf.mxu1 }
 0xbbb   : > { %v3006_v62 = vmul.f32 %v3005_v48, %v2999_v60 }
 0xbbc   : > { %v4139_v33 = vpop.f32.mrf.mxu1 }
 0xbbd   : > { %v3007_v53 = vmul.f32 %v3006_v62, %v2999_v60 }
 0xbbf   : > { %v3008_v63 = vadd.f32 %v3007_v53, %v2999_v60 }
 0xbc1   : > { %v3009_v0 = vmul.f32 0.7978846, %v3008_v63 }
 0xbc3   : > { %4325 = vtanh.f32 %v3009_v0 }
 0xbd0   : > { %v4326_v1 = vpop.eup %4325 }
 0xbd1   : > { %v3011_v3 = vadd.f32 1.0, %v4326_v1 }
 0xbd3   : > { %v3012_v21 = vmul.f32 %v3011_v3, %v3004_v2 }
 0xbd5   : > { %v3013_v9 = vpack.c.bf16 %v3012_v21, %v3012_v21 }
 0xbd7   : > { %4157 = vmatmul.mubr.bf16.vlgmr.msra.gmra.mxu0 %v3013_v9 }
 0xc97   : > { %v3119_v4 = vpop.f32.mrf.mxu0 }
 0xc98   : > { %v3120_v5 = vadd.f32 %v3931_v50, %v3119_v4 }
 0xc99   : > { %v4158_v40 = vpop.f32.mrf.mxu0  ;;  %3130 = sbr.rel (%p3940_p11) target bundleno = 3644 (0xe3c), region = 116 }
 0xc9a   : > { %v3125_v6 = vadd.f32 %v3120_v5, %v5281_v10 }
 0xc9b   : > { %v3122_v41 = vpop.f32.mrf.mxu0 }
 0xc9c   : > { %3126 = vst.msk [vmem:[#allocation2] sm:$0xff] %vm876_vm1, %v3125_v6 }
 0xc9d   : > { %v4159_v7 = vpop.f32.mrf.mxu0 }
 0xc9e   : > { %v4328_v8 = vld [vmem:[%s5620_s26 + $0x24] ss:$16 sps:$4 sm:$0xff]   ;;  %v4330_v27 = vld [vmem:[%s5620_s26 + $0x2c] ss:$16 sps:$4 sm:$0xff]   ;;  %v4631_v46 = vmov 0   ;;  %v3131_v15 = vpack.c.bf16 %v3125_v6, %v3125_v6  ;;  %v3184_v60 = vsub.s32 0, %v5069_v37 }
 0xc9f   : > { %3237 = vmatprep.mubr.bf16.mxu0 %v4631_v46  ;;  %3278 = vmatprep.mubr.bf16.mxu1 %v4631_v46  ;;  %v4332_v11 = vld [vmem:[%s5620_s26 + $0x20] ss:$16 sps:$4 sm:$0xff]   ;;  %v4333_v51 = vld [vmem:[%s5620_s26 + $0x28] ss:$16 sps:$4 sm:$0xff]   ;;  %v4334_v23 = vld [vmem:[%s5620_s26 + $0x4] ss:$16 sps:$4 sm:$0xff]  }
 0xca0   : > { %3217 = vmatprep.subr.bf16.mxu0 %v4328_v8  ;;  %3258 = vmatprep.subr.bf16.mxu1 %v4330_v27  ;;  %v4336_v12 = vld [vmem:[%s5620_s26 + $0xc] ss:$16 sps:$4 sm:$0xff]   ;;  %v4338_v13 = vld [vmem:[%s5620_s26] ss:$16 sps:$4 sm:$0xff]   ;;  %v4339_v14 = vld [vmem:[%s5620_s26 + $0x8] ss:$16 sps:$4 sm:$0xff]  }
 0xca1   : > { %3218 = vmatpush1.bf16.msra.mxu0 %v4332_v11  ;;  %3259 = vmatpush1.bf16.msra.mxu1 %v4333_v51  ;;  %v4340_v30 = vld [vmem:[%s5621_s23 + $0x78] sm:$0xff]   ;;  %v4344_v18 = vld [vmem:[%s5621_s23 + $0x70] sm:$0xff]   ;;  %v4348_v25 = vld [vmem:[%s5621_s23 + $0x68] sm:$0xff]   ;;  %v3192_v19 = vsub.s32 2, %v5069_v37  ;;  %v3188_v61 = vsub.s32 1, %v5069_v37  ;;  %v3196_v62 = vsub.s32 3, %v5069_v37 }
 0xca2   : > { %3219 = vmatprep.subr.bf16.mxu0 %v4334_v23  ;;  %3260 = vmatprep.subr.bf16.mxu1 %v4336_v12  ;;  %v4341_v10 = vld [vmem:[%s5621_s23 + $0xf8] sm:$0xff]   ;;  %v4345_v20 = vld [vmem:[%s5621_s23 + $0xf0] sm:$0xff]   ;;  %v4349_v26 = vld [vmem:[%s5621_s23 + $0xe8] sm:$0xff]  }
 0xca3   : > { %v4342_v16 = vld [vmem:[%s5621_s23 + $0x38] sm:$0xff]   ;;  %v4346_v22 = vld [vmem:[%s5621_s23 + $0x30] sm:$0xff]   ;;  %v4350_v31 = vld [vmem:[%s5621_s23 + $0x28] sm:$0xff]  }
 0xca4   : > { %v4343_v17 = vld [vmem:[%s5621_s23 + $0xb8] sm:$0xff]   ;;  %v4347_v24 = vld [vmem:[%s5621_s23 + $0xb0] sm:$0xff]   ;;  %v4351_v32 = vld [vmem:[%s5621_s23 + $0xa8] sm:$0xff]  }
 0xca5   : > { %3220 = vmatpush1.bf16.msra.mxu0 %v4338_v13  ;;  %3261 = vmatpush1.bf16.msra.mxu1 %v4339_v14  ;;  %v4352_v34 = vld [vmem:[%s5621_s23 + $0x60] sm:$0xff]   ;;  %v4356_v39 = vld [vmem:[%s5621_s23 + $0x58] sm:$0xff]   ;;  %v4360_v45 = vld [vmem:[%s5621_s23 + $0x50] sm:$0xff]  }
 0xca6   : > { %4024 = vmatprep.subr.bf16.mxu0 %v4340_v30  ;;  %4046 = vmatprep.subr.bf16.mxu1 %v4341_v10  ;;  %v4353_v35 = vld [vmem:[%s5621_s23 + $0xe0] sm:$0xff]   ;;  %v4357_v42 = vld [vmem:[%s5621_s23 + $0xd8] sm:$0xff]   ;;  %v4361_v47 = vld [vmem:[%s5621_s23 + $0xd0] sm:$0xff]  }
 0xca7   : > { %v4354_v36 = vld [vmem:[%s5621_s23 + $0x20] sm:$0xff]   ;;  %v4358_v43 = vld [vmem:[%s5621_s23 + $0x18] sm:$0xff]   ;;  %v4362_v49 = vld [vmem:[%s5621_s23 + $0x10] sm:$0xff]  }
 0xca8   : > { %3949 = vmatmul.mubr.msk.bf16.vlgmr.msra.gmra.mxu0 %vm876_vm1, %v3131_v15  ;;  %3950 = vmatmul.mubr.msk.bf16.vlgmr.msra.gmra.mxu1 %vm876_vm1, %v3131_v15  ;;  %v4355_v38 = vld [vmem:[%s5621_s23 + $0xa0] sm:$0xff]   ;;  %v4359_v44 = vld [vmem:[%s5621_s23 + $0x98] sm:$0xff]   ;;  %v4363_v52 = vld [vmem:[%s5621_s23 + $0x90] sm:$0xff]  }
 0xca9   : > { %4025 = vmatpush3.bf16.msra.mxu0 %v4342_v16  ;;  %4047 = vmatpush3.bf16.msra.mxu1 %v4343_v17  ;;  %v4364_v54 = vld [vmem:[%s5621_s23 + $0x48] sm:$0xff]   ;;  %v4368_v57 = vld [vmem:[%s5621_s23 + $0x40] sm:$0xff]  }
 0xcaa   : > { %4026 = vmatprep.subr.bf16.mxu0 %v4344_v18  ;;  %4048 = vmatprep.subr.bf16.mxu1 %v4345_v20  ;;  %v4365_v55 = vld [vmem:[%s5621_s23 + $0xc8] sm:$0xff]   ;;  %v4369_v29 = vld [vmem:[%s5621_s23 + $0xc0] sm:$0xff]  }
 0xcab   : > { %v4366_v56 = vld [vmem:[%s5621_s23 + $0x8] sm:$0xff]   ;;  %v4370_v58 = vld [vmem:[%s5621_s23] sm:$0xff]  }
 0xcac   : > { %v4367_v28 = vld [vmem:[%s5621_s23 + $0x88] sm:$0xff]   ;;  %v4371_v59 = vld [vmem:[%s5621_s23 + $0x80] sm:$0xff]  }
 0xcad   : > { %4027 = vmatpush3.bf16.msra.mxu0 %v4346_v22  ;;  %4049 = vmatpush3.bf16.msra.mxu1 %v4347_v24  ;;  %v3140_v48 = vld [vmem:[%s5622_s8] sm:$0xf] }
 0xcae   : > { %4028 = vmatprep.subr.bf16.mxu0 %v4348_v25  ;;  %4050 = vmatprep.subr.bf16.mxu1 %v4349_v26  ;;  %v3185_v33 = vrot.slane %v3140_v48, %v3184_v60  ;;  %v3193_v53 = vrot.slane %v3140_v48, %v3192_v19  ;;  %v3189_v63 = vrot.slane %v3140_v48, %v3188_v61  ;;  %v3359_v30 = vld [vmem:[%s5623_s12] sm:$0x1] }
 0xcaf   : > { %v3197_v0 = vrot.slane %v3140_v48, %v3196_v62 }
 0xcb1   : > { %4029 = vmatpush3.bf16.msra.mxu0 %v4350_v31  ;;  %4051 = vmatpush3.bf16.msra.mxu1 %v4351_v32 }
 0xcb2   : > { %4030 = vmatprep.subr.bf16.mxu0 %v4352_v34  ;;  %4052 = vmatprep.subr.bf16.mxu1 %v4353_v35 }
 0xcb5   : > { %4031 = vmatpush3.bf16.msra.mxu0 %v4354_v36  ;;  %4053 = vmatpush3.bf16.msra.mxu1 %v4355_v38 }
 0xcb6   : > { %4032 = vmatprep.subr.bf16.mxu0 %v4356_v39  ;;  %4054 = vmatprep.subr.bf16.mxu1 %v4357_v42 }
 0xcb9   : > { %4033 = vmatpush3.bf16.msra.mxu0 %v4358_v43  ;;  %4055 = vmatpush3.bf16.msra.mxu1 %v4359_v44 }
 0xcba   : > { %4034 = vmatprep.subr.bf16.mxu0 %v4360_v45  ;;  %4056 = vmatprep.subr.bf16.mxu1 %v4361_v47 }
 0xcbd   : > { %4035 = vmatpush3.bf16.msra.mxu0 %v4362_v49  ;;  %4057 = vmatpush3.bf16.msra.mxu1 %v4363_v52 }
 0xcbe   : > { %4036 = vmatprep.subr.bf16.mxu0 %v4364_v54  ;;  %4058 = vmatprep.subr.bf16.mxu1 %v4365_v55 }
 0xcc1   : > { %4037 = vmatpush3.bf16.msra.mxu0 %v4366_v56  ;;  %4059 = vmatpush3.bf16.msra.mxu1 %v4367_v28 }
 0xcc2   : > { %4038 = vmatprep.subr.bf16.mxu0 %v4368_v57  ;;  %4060 = vmatprep.subr.bf16.mxu1 %v4369_v29 }
 0xcc5   : > { %4039 = vmatpush3.bf16.msra.mxu0 %v4370_v58  ;;  %4061 = vmatpush3.bf16.msra.mxu1 %v4371_v59 }
 0xd68   : > { %v3239_v1 = vpop.f32.mrf.mxu0  ;;  %v3280_v2 = vpop.f32.mrf.mxu1 }
 0xd69   : > { %v3240_v3 = vadd.f32 %v3239_v1, %v3185_v33  ;;  %v3281_v21 = vadd.f32 %v3280_v2, %v3193_v53 }
 0xd6a   : > { %v3241_v9 = vpop.f32.mrf.mxu0  ;;  %v3282_v50 = vpop.f32.mrf.mxu1 }
 0xd6b   : > { %v3289_v4 = vmax.f32 %v3281_v21, 0.0  ;;  %v3242_v5 = vadd.f32 %v3241_v9, %v3189_v63  ;;  %v3283_v40 = vadd.f32 %v3282_v50, %v3197_v0  ;;  %v3287_v6 = vmax.f32 %v3240_v3, 0.0 }
 0xd6c   : > { %v3243_v41 = vpop.f32.mrf.mxu0  ;;  %v3284_v7 = vpop.f32.mrf.mxu1 }
 0xd6d   : > { %v3288_v8 = vmax.f32 %v3242_v5, 0.0  ;;  %v3290_v27 = vmax.f32 %v3283_v40, 0.0  ;;  %v3293_v46 = vpack.c.bf16 %v3289_v4, %v3289_v4  ;;  %v3291_v12 = vpack.c.bf16 %v3287_v6, %v3287_v6 }
 0xd6e   : > { %v3244_v37 = vpop.f32.mrf.mxu0  ;;  %v3285_v11 = vpop.f32.mrf.mxu1 }
 0xd6f   : > { %v3292_v51 = vpack.c.bf16 %v3288_v8, %v3288_v8  ;;  %v3294_v23 = vpack.c.bf16 %v3290_v27, %v3290_v27 }
 0xd71   : > { %3584 = vmatprep.mubr.bf16.mxu0 %v3292_v51  ;;  %3624 = vmatprep.mubr.bf16.mxu1 %v3294_v23 }
 0xd72   : > { %3585 = vmatmul.mubr.bf16.vlgmr.msra.gmra.mxu0 %v3291_v12  ;;  %3625 = vmatmul.mubr.bf16.vlgmr.msra.gmra.mxu1 %v3293_v46 }
 0xe32   : > { %v4040_v13 = vpop.f32.mrf.mxu0  ;;  %v4062_v14 = vpop.f32.mrf.mxu1 }
 0xe34   : > { %v4041_v15 = vpop.f32.mrf.mxu0  ;;  %v4063_v10 = vpop.f32.mrf.mxu1 }
 0xe35   : > { %v4042_v16 = vadd.f32 %v4041_v15, %v4040_v13  ;;  %v4064_v22 = vadd.f32 %v4063_v10, %v4062_v14 }
 0xe36   : > { %v4043_v17 = vpop.f32.mrf.mxu0  ;;  %v4065_v18 = vpop.f32.mrf.mxu1 }
 0xe37   : > { %v3587_v20 = vadd.f32 %v4042_v16, %v3359_v30 }
 0xe38   : > { %v4044_v24 = vpop.f32.mrf.mxu0  ;;  %v4066_v25 = vpop.f32.mrf.mxu1 }
 0xe39   : > { %v3627_v26 = vadd.f32 %v4064_v22, %v3587_v20 }
 0xe3b   : > { %3632 = vst [vmem:[%s825_s18] sm:$0x1] %v3627_v26 }
 0xe3c PF: > { %s5624_s14 = sld [smem:[#allocation22_spill]]  ;;  %s3646_s17 = sshll.u32 %s825_s18, 4  ;;  %s3647_s17 = int_to_ptr.vmem [resolvable:$true] %s3646_s17 }
 0xe3d   : > { %s5625_s27 = sld [smem:[#allocation48_spill]]  ;;  %s3634_s28 = scalar_lea.sflag [#allocation5], %s4942_s13 }
 0xe3e   : > { %s4484_s22 = scalar_lea.vmem %s3647_s17, 16  ;;  %p5627_p1 = scmp.ne.s32.totalorder %s5587_s25, 0 }
 0xe3f   : > { %p4485_p12 = scmp.ne.s32.totalorder %s3647_s17, %s4484_s22  ;;  %s4632_s15 = smov [#allocation11]  }
 0xe40   : > { %s4488_s7 = sshll.u32 %s4632_s15, 4  ;;  %s4489_s7 = int_to_ptr.vmem [resolvable:$false] %s4488_s7 }
 0xe41   : > { %p4486_p0 = pnand %p4485_p12, %p5627_p1  ;;  %s4490_s5 = scalar_lea.vmem %s4489_s7, 32 }
 0xe42   : > { %s3983_s10 = sshll.u32 %s5624_s14, 4  ;;  %p4491_p8 = scmp.lt.s32.totalorder %s3647_s17, %s4489_s7 }
 0xe43   : > { %s5626_s9 = smov %s5625_s27  ;;  %s3644_s11 = scalar_lea.hbm %s5625_s27, %s3983_s10 }
 0xe44   : > { %p4487_p3 = pneg %p4486_p0  ;;  %p4492_p13 = scmp.lt.s32.totalorder %s4490_s5, %s4484_s22 }
 0xe46   : > { %p4493_p4 = por %p4492_p13, %p4491_p8 }
 0xe48   : > { %p4494_p10 = pnand %p4493_p4, %p4487_p3 }
 0xe4a   : > { %4497 = shalt.err (!%p4494_p10)
}
 0xe4b   : > { %s4498_s3 = scalar_lea.hbm %s3644_s11, 16  ;;  %s4502_s4 = scalar_lea.hbm %s5626_s9, 32 }
 0xe4c   : > { %p4499_p5 = scmp.ne.s32.totalorder %s3644_s11, %s4498_s3  ;;  %p4503_p2 = scmp.lt.s32.totalorder %s3644_s11, %s5626_s9 }
 0xe4d   : > { %p4504_p7 = scmp.lt.s32.totalorder %s4502_s4, %s4498_s3 }
 0xe4e   : > { %p4500_p6 = pnand %p4499_p5, %p5627_p1 }
 0xe4f   : > { %p4505_p11 = por %p4504_p7, %p4503_p2 }
 0xe50   : > { %p4501_p9 = pneg %p4500_p6 }
 0xe52   : > { %p4506_p12 = pnand %p4505_p11, %p4501_p9 }
 0xe54   : > { %4509 = shalt.err (!%p4506_p12)
}
 0xe55   : > { %4168 = dma.vmem_to_hbm [thread:$0]  (%p5627_p1), %s3647_s17, 16, %s3644_s11, %s3634_s28  }
 0xe56 PF: > { %s5628_s30 = sld [smem:[#allocation18_spill]]  ;;  %p4188_p0 = scmp.ge.s32.totalorder %s4612_s2, 2 }
 0xe57   : > { %s5629_s20 = sld [smem:[#allocation28_spill]] }
 0xe5c   : > { %s3658_s21 = sand.u32 1, %s5628_s30  }
 0xe5d   : > { %p5630_p3 = scmp.ne.s32.totalorder %s5629_s20, 0  ;;  %s3659_s1 = scalar_lea.sflag [#allocation5], %s3658_s21 }
 0xe5f   : > { %p4184_p8 = pnand %p4188_p0, %p5630_p3 }
 0xe61   : > { %p4185_p13 = pneg %p4184_p8 }
 0xe63   : > { %4567 = dma.done.wait (%p4185_p13), %s3659_s1, 16  }
 0xe64   : > { %4569 = vsyncadd (%p4185_p13), %s3659_s1, 4294967280  ;;  %s40_s2 = sadd.s32 1, %s4612_s2   ;;  %s5631_s27 = sld [smem:[#allocation16_spill]] }
 0xe65   : > { %p37_p4 = scmp.ge.s32.totalorder %s40_s2, 26   ;;  %s5632_s28 = sld [smem:[#allocation17_spill]] }
 0xe66   : > { %s5633_s29 = sld [smem:[#allocation26_spill]] }
 0xe67   : > { %s5634_s30 = sld [smem:[#allocation19_spill]] }
 0xe68   : > { %s5635_s0 = sld [smem:[#allocation20_spill]] }
 0xe69   : > { %s5636_s19 = sld [smem:[#allocation29_spill]]  ;;  %39 = sbr.rel (!%p37_p4) target bundleno = 33 (0x21), region = 212 }
 0xe6a   : > { %s5637_s1 = sld [smem:[#allocation23_spill]] }
 0xe6b   : > { %s5638_s20 = sld [smem:[#allocation24_spill]] }
 0xe6c   : > { %s5639_s21 = sld [smem:[#allocation25_spill]] }
 0xe6d   : > { %s5640_s22 = sld [smem:[#allocation27_spill]] }
 0xe6e   :  { %3663 = vsyncpa [#allocation4], 1 }
 0xe6f   :  { %3665 = vsyncpa [#allocation4 + $0x1], 1 }
 0xe70   :  { %3666 = vsyncpa [#allocation7], 1 }
 0xe71   :  { %3668 = vsyncpa [#allocation7 + $0x1], 1 }
 0xe72   :  { %3669 = vsyncpa [#allocation10], 1 }
 0xe73   :  { %3671 = vsyncpa [#allocation10 + $0x1], 1 }
 0xe74   :  { %3672 = vsyncpa [#allocation5], 1 }
 0xe75   :  { %3674 = vsyncpa [#allocation5 + $0x1], 1 }

</bundles_post_ra>
